<compile_context>
chip_gen: v6e
topology: v6e:2x2x1
jax: 0.10.0
libtpu: 0.0.40
codegen_flags: <defaults>
</compile_context>

<pallas_src>
import functools

import jax
import jax.numpy as jnp
from jax.experimental import pallas as pl
from jax.experimental.pallas import tpu as pltpu


def _round_up(x, m):
    return -(-x // m) * m


def _emp_kernel(sv_ref, ddir_ref, src_ref, dst_ref,
                w1_ref, b1_ref, w2_ref, b2_ref, wd_ref, bd_ref,
                out_ref, table_ref, acc_ref, msg_ref, *, h_dim, tab_w):
    f32 = jnp.float32
    H = h_dim
    e = pl.program_id(1)                       # inner (edge-tile) axis, sequential
    n_nodes = table_ref.shape[0]               # padded node count (static)
    t_e = src_ref.shape[0]                     # edge tile size (static)

    # ---- per-core init: build node table [s_exp | packed v], zero accumulator ----
    @pl.when(e == 0)
    def _init():
        s = sv_ref[:, :H]                                                  # [N, H]
        hidden = jnp.tanh(
            jnp.dot(s, w1_ref[...], preferred_element_type=f32) + b1_ref[...])
        s_exp = (jnp.dot(hidden, w2_ref[...], preferred_element_type=f32)
                 + b2_ref[...])                                            # [N, 3H]
        table_ref[:, :3 * H] = s_exp                                       # slice stores,
        table_ref[:, 3 * H:6 * H] = sv_ref[:, H:]                          # no lane concat
        if tab_w > 6 * H:  # static: zero the 128-lane alignment padding
            table_ref[:, 6 * H:] = jnp.zeros((n_nodes, tab_w - 6 * H), f32)
        acc_ref[...] = jnp.zeros_like(acc_ref)

    # ---- build gather/scatter masks in-kernel from the int32 edge indices ----
    src_idx = src_ref[...]                                                 # [tE, 1]
    dst_idx = dst_ref[...]                                                 # [1, tE]
    src_mask = (jax.lax.broadcasted_iota(jnp.int32, (t_e, n_nodes), 1)
                == src_idx).astype(f32)                                    # [tE, N]
    dst_mask = (jax.lax.broadcasted_iota(jnp.int32, (n_nodes, t_e), 0)
                == dst_idx).astype(f32)                                    # [N, tE]

    # gather: one MXU matmul  [tE, N] @ [N, tab_w]
    gathered = jnp.dot(src_mask, table_ref[...], preferred_element_type=f32)

    # fused distance expansion (wd/bd already fused to 3H lanes)
    d = ddir_ref[:, 0:1]                                                   # [tE, 1]
    dist = d * wd_ref[...] + bd_ref[...]                                   # [tE, 3H]

    grouped = gathered[:, :3 * H] * dist
    dv_v = grouped[:, :H]                    # gates v[src]
    ds_e = grouped[:, H:2 * H]               # scalar message
    dvr = grouped[:, 2 * H:3 * H]            # gates dir_ij

    # stage the [tE, 4H] message with slice stores (no lane concatenation)
    msg_ref[:, :H] = ds_e
    for k in range(3):                       # static unroll over x, y, z
        gv_k = gathered[:, (3 + k) * H:(4 + k) * H]          # v[src] component k
        msg_ref[:, (1 + k) * H:(2 + k) * H] = (dvr * ddir_ref[:, 1 + k:2 + k]
                                               + dv_v * gv_k)

    # scatter: one MXU matmul  [N, tE] @ [tE, 4H], accumulated across tiles
    acc_ref[...] += jnp.dot(dst_mask, msg_ref[...], preferred_element_type=f32)

    # ---- last inner step of this split: write this core's partial slab ----
    @pl.when(e == pl.num_programs(1) - 1)
    def _finalize():
        out_ref[...] = acc_ref[...]


def equivariant_message_layer(v, s, edge_index, d_ij, dir_ij, params,
                              *, edge_tile=256, n_split=2):
    """v: [N, 3, H], s: [N, H], edge_index: [2, E] int32, d_ij: [E, 1], dir_ij: [E, 3]."""
    N, three, H = v.shape
    assert three == 3
    E = edge_index.shape[1]
    f32 = jnp.float32

    n_pad = _round_up(max(N, 8), 8)                 # sublane-aligned node count
    tab_w = _round_up(6 * H, 128)                   # 128-lane-aligned node table

    # edge tiling: tiles are multiples of 128 lanes; edges split into n_split
    # contiguous ranges (outer "parallel" grid axis -> v7x second TensorCore).
    per_split = -(-E // n_split)
    t_e = _round_up(min(edge_tile, _round_up(per_split, 128)), 128)
    inner = max(1, -(-per_split // t_e))
    e_pad = n_split * inner * t_e
    pad_e = e_pad - E

    # padded edges point at index n_pad (matches no node) -> contribute nothing.
    src = jnp.concatenate([edge_index[0].astype(jnp.int32),
                           jnp.full((pad_e,), n_pad, jnp.int32)])[:, None]   # [E_pad, 1]
    dst = jnp.concatenate([edge_index[1].astype(jnp.int32),
                           jnp.full((pad_e,), n_pad, jnp.int32)])[None, :]   # [1, E_pad]

    # pack [d | dir] into one small per-edge input
    ddir = jnp.concatenate([d_ij.astype(f32), dir_ij.astype(f32)], axis=-1)
    ddir = jnp.concatenate([ddir, jnp.zeros((pad_e, 4), f32)], axis=0)       # [E_pad, 4]

    # lane-dense node slab [s | v_x | v_y | v_z] -> [N_pad, 4H]
    sv = jnp.concatenate([s.astype(f32), v.astype(f32).reshape(N, 3 * H)], axis=-1)
    sv = jnp.concatenate([sv, jnp.zeros((n_pad - N, 4 * H), f32)], axis=0)

    # VMEM budget from actual buffer sizes, 2x headroom, clamped to [16, 48] MiB
    need = 4 * (2 * n_pad * 4 * H            # sv input (double-buffered)
                + n_pad * tab_w              # table scratch
                + n_pad * 4 * H              # accumulator scratch
                + 2 * n_pad * 4 * H          # output slab (double-buffered)
                + t_e * 4 * H                # msg scratch
                + 2 * (t_e * 4 + 2 * t_e)    # per-tile ddir + indices (db)
                + 2 * (H * H + 10 * H))      # weights
    vmem_limit = int(min(max(2 * need, 16 << 20), 48 << 20))

    kernel = functools.partial(_emp_kernel, h_dim=H, tab_w=tab_w)

    def edge_map(p, e):
        return (p * inner + e, 0)

    partials = pl.pallas_call(
        kernel,
        out_shape=jax.ShapeDtypeStruct((n_split, n_pad, 4 * H), f32),
        grid=(n_split, inner),
        in_specs=[
            pl.BlockSpec((n_pad, 4 * H), lambda p, e: (0, 0)),        # sv (resident)
            pl.BlockSpec((t_e, 4), edge_map),                         # [d | dir] packed
            pl.BlockSpec((t_e, 1), edge_map),                         # src indices
            pl.BlockSpec((1, t_e), lambda p, e: (0, p * inner + e)),  # dst indices (lanes)
            pl.BlockSpec((H, H), lambda p, e: (0, 0)),                # w1
            pl.BlockSpec((1, H), lambda p, e: (0, 0)),                # b1
            pl.BlockSpec((H, 3 * H), lambda p, e: (0, 0)),            # w2 (fused)
            pl.BlockSpec((1, 3 * H), lambda p, e: (0, 0)),            # b2 (fused)
            pl.BlockSpec((1, 3 * H), lambda p, e: (0, 0)),            # wd (fused)
            pl.BlockSpec((1, 3 * H), lambda p, e: (0, 0)),            # bd (fused)
        ],
        out_specs=pl.BlockSpec((None, n_pad, 4 * H), lambda p, e: (p, 0, 0)),
        scratch_shapes=[pltpu.VMEM((n_pad, tab_w), f32),              # node table
                        pltpu.VMEM((n_pad, 4 * H), f32),              # scatter accumulator
                        pltpu.VMEM((t_e, 4 * H), f32)],               # staged message
        compiler_params=pltpu.CompilerParams(
            dimension_semantics=("parallel", "arbitrary"),
            vmem_limit_bytes=vmem_limit),
    )(sv, ddir, src, dst,
      params["w1"], params["b1"], params["w2"], params["b2"],
      params["wd"], params["bd"])

    # combine partial slabs, mean-normalize, add residual (O(N*H) wrapper work)
    total = jnp.sum(partials, axis=0)[:N]
    counts = jax.ops.segment_sum(jnp.ones((E,), f32), edge_index[1], num_segments=N)
    inv = (1.0 / jnp.maximum(counts, 1.0))[:, None]
    s_out = s + total[:, :H] * inv
    v_out = v + (total[:, H:] * inv).reshape(N, 3, H)
    return v_out, s_out


def reference(v, s, edge_index, d_ij, dir_ij, params):
    """Pure-JAX reference mirroring the PyTorch forward (scatter 'mean')."""
    N, H = s.shape
    hidden = jnp.tanh(s @ params["w1"] + params["b1"])
    s_exp = hidden @ params["w2"] + params["b2"]                # [N, 3H]
    dist_exp = d_ij @ params["wd"] + params["bd"]               # [E, 3H]
    grouped = s_exp[edge_index[0]] * dist_exp                   # [E, 3H]
    dv_v, ds_e, dvr = jnp.split(grouped, 3, axis=-1)

    E = edge_index.shape[1]
    counts = jax.ops.segment_sum(jnp.ones((E,), jnp.float32), edge_index[1], N)
    inv = 1.0 / jnp.maximum(counts, 1.0)
    ds = jax.ops.segment_sum(ds_e, edge_index[1], N) * inv[:, None]
    dv_e = (dvr[:, None, :] * dir_ij[:, :, None]
            + dv_v[:, None, :] * v[edge_index[0]])
    dv = jax.ops.segment_sum(dv_e, edge_index[1], N) * inv[:, None, None]
    return v + dv, s + ds


def make_params(key, H):
    ks = jax.random.split(key, 6)
    scale = 0.1
    # weights stored [in, out]; w2/b2/wd/bd already fused to 3H (chunk order:
    # dv_v-gate | scalar | dir-gate), matching torch.split(..., h_dim, dim=-1).
    return {
        "w1": scale * jax.random.normal(ks[0], (H, H), jnp.float32),
        "b1": scale * jax.random.normal(ks[1], (1, H), jnp.float32),
        "w2": scale * jax.random.normal(ks[2], (H, 3 * H), jnp.float32),
        "b2": scale * jax.random.normal(ks[3], (1, 3 * H), jnp.float32),
        "wd": scale * jax.random.normal(ks[4], (1, 3 * H), jnp.float32),
        "bd": scale * jax.random.normal(ks[5], (1, 3 * H), jnp.float32),
    }


if __name__ == "__main__":
    N, E, H = 16, 256, 32
    key = jax.random.PRNGKey(0)
    k_v, k_s, k_e, k_d, k_dir, k_p = jax.random.split(key, 6)

    v = jax.random.normal(k_v, (N, 3, H), jnp.float32)
    s = jax.random.normal(k_s, (N, H), jnp.float32)
    edge_index = jax.random.randint(k_e, (2, E), 0, N, jnp.int32)
    d_ij = jax.random.uniform(k_d, (E, 1), jnp.float32, 0.5, 3.0)
    dir_raw = jax.random.normal(k_dir, (E, 3), jnp.float32)
    dir_ij = dir_raw / jnp.linalg.norm(dir_raw, axis=-1, keepdims=True)
    params = make_params(k_p, H)

    v_out, s_out = equivariant_message_layer(v, s, edge_index, d_ij, dir_ij,
                                             params, edge_tile=256, n_split=2)
    jax.block_until_ready((v_out, s_out))

    v_ref, s_ref = reference(v, s, edge_index, d_ij, dir_ij, params)
    assert jnp.allclose(v_out, v_ref, rtol=1e-4, atol=1e-5), "v mismatch"
    assert jnp.allclose(s_out, s_ref, rtol=1e-4, atol=1e-5), "s mismatch"

    print("KERNEL_OK")
</pallas_src>

<mosaic_0001>
module attributes {stable_mosaic.version = 11 : i64} {
  func.func @_emp_kernel(%arg0: i32, %arg1: i32, %arg2: memref<16x128xf32, #tpu.memory_space<vmem>>, %arg3: memref<128x4xf32, #tpu.memory_space<vmem>>, %arg4: memref<128x1xi32, #tpu.memory_space<vmem>>, %arg5: memref<1x128xi32, #tpu.memory_space<vmem>>, %arg6: memref<32x32xf32, #tpu.memory_space<vmem>>, %arg7: memref<1x32xf32, #tpu.memory_space<vmem>>, %arg8: memref<32x96xf32, #tpu.memory_space<vmem>>, %arg9: memref<1x96xf32, #tpu.memory_space<vmem>>, %arg10: memref<1x96xf32, #tpu.memory_space<vmem>>, %arg11: memref<1x96xf32, #tpu.memory_space<vmem>>, %arg12: memref<1x16x128xf32, #tpu.memory_space<vmem>>, %arg13: memref<16x256xf32, #tpu.memory_space<vmem>>, %arg14: memref<16x128xf32, #tpu.memory_space<vmem>>, %arg15: memref<128x128xf32, #tpu.memory_space<vmem>>) attributes {dimension_semantics = [#tpu.dimension_semantics<parallel>, #tpu.dimension_semantics<arbitrary>], iteration_bounds = array<i64: 2, 1>, scalar_prefetch = 0 : i64, scratch_operands = 3 : i64, tpu.core_type = #tpu.core_type<tc>, window_params = [{pipeline_mode = #tpu.pipeline_mode<synchronous>, transform_indices = @transform_0, window_bounds = array<i64: 16, 128>}, {transform_indices = @transform_1, window_bounds = array<i64: 128, 4>}, {transform_indices = @transform_2, window_bounds = array<i64: 128, 1>}, {transform_indices = @transform_3, window_bounds = array<i64: 1, 128>}, {pipeline_mode = #tpu.pipeline_mode<synchronous>, transform_indices = @transform_4, window_bounds = array<i64: 32, 32>}, {pipeline_mode = #tpu.pipeline_mode<synchronous>, transform_indices = @transform_5, window_bounds = array<i64: 1, 32>}, {pipeline_mode = #tpu.pipeline_mode<synchronous>, transform_indices = @transform_6, window_bounds = array<i64: 32, 96>}, {pipeline_mode = #tpu.pipeline_mode<synchronous>, transform_indices = @transform_7, window_bounds = array<i64: 1, 96>}, {pipeline_mode = #tpu.pipeline_mode<synchronous>, transform_indices = @transform_8, window_bounds = array<i64: 1, 96>}, {pipeline_mode = #tpu.pipeline_mode<synchronous>, transform_indices = @transform_9, window_bounds = array<i64: 1, 96>}, {transform_indices = @transform_10, window_bounds = array<i64: 1, 16, 128>}]} {
    %c0_i32 = arith.constant 0 : i32
    %0 = arith.cmpi eq, %arg1, %c0_i32 : i32
    %1 = arith.extui %0 : i1 to i32
    %c0_i32_0 = arith.constant 0 : i32
    %2 = arith.cmpi ne, %1, %c0_i32_0 : i32
    scf.if %2 {
      %c0_29 = arith.constant 0 : index
      %c0_30 = arith.constant 0 : index
      %60 = vector.load %arg2[%c0_29, %c0_30] : memref<16x128xf32, #tpu.memory_space<vmem>>, vector<16x32xf32>
      %c0_31 = arith.constant 0 : index
      %c0_32 = arith.constant 0 : index
      %61 = vector.load %arg6[%c0_31, %c0_32] : memref<32x32xf32, #tpu.memory_space<vmem>>, vector<32x32xf32>
      %cst_33 = arith.constant dense<0.000000e+00> : vector<16x32xf32>
      %62 = tpu.matmul %60, %61, %cst_33 {dimension_numbers = #tpu.dot_dimension_numbers<[1], [0], [0], [1], [0, 0, 1, 1], [], []>} : vector<16x32xf32>, vector<32x32xf32>, vector<16x32xf32> -> vector<16x32xf32>
      %c0_34 = arith.constant 0 : index
      %c0_35 = arith.constant 0 : index
      %63 = vector.load %arg7[%c0_34, %c0_35] : memref<1x32xf32, #tpu.memory_space<vmem>>, vector<1x32xf32>
      %64 = vector.broadcast %63 : vector<1x32xf32> to vector<16x32xf32>
      %65 = arith.addf %62, %64 : vector<16x32xf32>
      %66 = math.tanh %65 : vector<16x32xf32>
      %c0_36 = arith.constant 0 : index
      %c0_37 = arith.constant 0 : index
      %67 = vector.load %arg8[%c0_36, %c0_37] : memref<32x96xf32, #tpu.memory_space<vmem>>, vector<32x96xf32>
      %cst_38 = arith.constant dense<0.000000e+00> : vector<16x96xf32>
      %68 = tpu.matmul %66, %67, %cst_38 {dimension_numbers = #tpu.dot_dimension_numbers<[1], [0], [0], [1], [0, 0, 1, 1], [], []>} : vector<16x32xf32>, vector<32x96xf32>, vector<16x96xf32> -> vector<16x96xf32>
      %c0_39 = arith.constant 0 : index
      %c0_40 = arith.constant 0 : index
      %69 = vector.load %arg9[%c0_39, %c0_40] : memref<1x96xf32, #tpu.memory_space<vmem>>, vector<1x96xf32>
      %70 = vector.broadcast %69 : vector<1x96xf32> to vector<16x96xf32>
      %71 = arith.addf %68, %70 : vector<16x96xf32>
      %c0_41 = arith.constant 0 : index
      %c0_42 = arith.constant 0 : index
      %72 = vector.load %arg13[%c0_41, %c0_42] : memref<16x256xf32, #tpu.memory_space<vmem>>, vector<16x96xf32>
      tpu.vector_store %arg13[%c0_41, %c0_42], %71 {strides = array<i32>} : memref<16x256xf32, #tpu.memory_space<vmem>>, vector<16x96xf32>,
      %c0_43 = arith.constant 0 : index
      %c32_44 = arith.constant 32 : index
      %73 = vector.load %arg2[%c0_43, %c32_44] : memref<16x128xf32, #tpu.memory_space<vmem>>, vector<16x96xf32>
      %c0_45 = arith.constant 0 : index
      %c96_46 = arith.constant 96 : index
      %74 = vector.load %arg13[%c0_45, %c96_46] : memref<16x256xf32, #tpu.memory_space<vmem>>, vector<16x96xf32>
      tpu.vector_store %arg13[%c0_45, %c96_46], %73 {strides = array<i32>} : memref<16x256xf32, #tpu.memory_space<vmem>>, vector<16x96xf32>,
      %cst_47 = arith.constant 0.000000e+00 : f32
      %75 = vector.broadcast %cst_47 : f32 to vector<16x64xf32>
      %c0_48 = arith.constant 0 : index
      %c192 = arith.constant 192 : index
      %76 = vector.load %arg13[%c0_48, %c192] : memref<16x256xf32, #tpu.memory_space<vmem>>, vector<16x64xf32>
      tpu.vector_store %arg13[%c0_48, %c192], %75 {strides = array<i32>} : memref<16x256xf32, #tpu.memory_space<vmem>>, vector<16x64xf32>,
      %cst_49 = arith.constant 0.000000e+00 : f32
      %77 = vector.broadcast %cst_49 : f32 to vector<16x128xf32>
      %c0_50 = arith.constant 0 : index
      %c0_51 = arith.constant 0 : index
      %78 = vector.load %arg14[%c0_50, %c0_51] : memref<16x128xf32, #tpu.memory_space<vmem>>, vector<16x128xf32>
      tpu.vector_store %arg14[%c0_50, %c0_51], %77 {strides = array<i32>} : memref<16x128xf32, #tpu.memory_space<vmem>>, vector<16x128xf32>,
    } else {
    }
    %c0 = arith.constant 0 : index
    %c0_1 = arith.constant 0 : index
    %3 = vector.load %arg4[%c0, %c0_1] : memref<128x1xi32, #tpu.memory_space<vmem>>, vector<128x1xi32>
    %c0_2 = arith.constant 0 : index
    %c0_3 = arith.constant 0 : index
    %4 = vector.load %arg5[%c0_2, %c0_3] : memref<1x128xi32, #tpu.memory_space<vmem>>, vector<1x128xi32>
    %5 = tpu.iota {dimensions = array<i32: 1>} : vector<128x16xi32>
    %6 = vector.broadcast %3 : vector<128x1xi32> to vector<128x16xi32>
    %7 = arith.cmpi eq, %5, %6 : vector<128x16xi32>
    %8 = arith.extui %7 : vector<128x16xi1> to vector<128x16xi32>
    %9 = arith.sitofp %8 : vector<128x16xi32> to vector<128x16xf32>
    %10 = tpu.iota {dimensions = array<i32: 0>} : vector<16x128xi32>
    %11 = vector.broadcast %4 : vector<1x128xi32> to vector<16x128xi32>
    %12 = arith.cmpi eq, %10, %11 : vector<16x128xi32>
    %13 = arith.extui %12 : vector<16x128xi1> to vector<16x128xi32>
    %14 = arith.sitofp %13 : vector<16x128xi32> to vector<16x128xf32>
    %c0_4 = arith.constant 0 : index
    %c0_5 = arith.constant 0 : index
    %15 = vector.load %arg13[%c0_4, %c0_5] : memref<16x256xf32, #tpu.memory_space<vmem>>, vector<16x256xf32>
    %cst = arith.constant dense<0.000000e+00> : vector<128x256xf32>
    %16 = tpu.matmul %9, %15, %cst {dimension_numbers = #tpu.dot_dimension_numbers<[1], [0], [0], [1], [0, 0, 1, 1], [], []>} : vector<128x16xf32>, vector<16x256xf32>, vector<128x256xf32> -> vector<128x256xf32>
    %c0_6 = arith.constant 0 : index
    %c0_7 = arith.constant 0 : index
    %17 = vector.load %arg3[%c0_6, %c0_7] : memref<128x4xf32, #tpu.memory_space<vmem>>, vector<128x1xf32>
    %c0_8 = arith.constant 0 : index
    %c0_9 = arith.constant 0 : index
    %18 = vector.load %arg10[%c0_8, %c0_9] : memref<1x96xf32, #tpu.memory_space<vmem>>, vector<1x96xf32>
    %19 = vector.broadcast %17 : vector<128x1xf32> to vector<128x96xf32>
    %20 = vector.broadcast %18 : vector<1x96xf32> to vector<128x96xf32>
    %21 = arith.mulf %19, %20 : vector<128x96xf32>
    %c0_10 = arith.constant 0 : index
    %c0_11 = arith.constant 0 : index
    %22 = vector.load %arg11[%c0_10, %c0_11] : memref<1x96xf32, #tpu.memory_space<vmem>>, vector<1x96xf32>
    %23 = vector.broadcast %22 : vector<1x96xf32> to vector<128x96xf32>
    %24 = arith.addf %21, %23 : vector<128x96xf32>
    %25 = vector.extract_strided_slice %16 {offsets = [0, 0], sizes = [128, 96], strides = [1, 1]} : vector<128x256xf32> to vector<128x96xf32>
    %26 = arith.mulf %25, %24 : vector<128x96xf32>
    %27 = vector.extract_strided_slice %26 {offsets = [0, 0], sizes = [128, 32], strides = [1, 1]} : vector<128x96xf32> to vector<128x32xf32>
    %28 = vector.extract_strided_slice %26 {offsets = [0, 32], sizes = [128, 32], strides = [1, 1]} : vector<128x96xf32> to vector<128x32xf32>
    %29 = vector.extract_strided_slice %26 {offsets = [0, 64], sizes = [128, 32], strides = [1, 1]} : vector<128x96xf32> to vector<128x32xf32>
    %c0_12 = arith.constant 0 : index
    %c0_13 = arith.constant 0 : index
    %30 = vector.load %arg15[%c0_12, %c0_13] : memref<128x128xf32, #tpu.memory_space<vmem>>, vector<128x32xf32>
    tpu.vector_store %arg15[%c0_12, %c0_13], %28 {strides = array<i32>} : memref<128x128xf32, #tpu.memory_space<vmem>>, vector<128x32xf32>,
    %31 = vector.extract_strided_slice %16 {offsets = [0, 96], sizes = [128, 32], strides = [1, 1]} : vector<128x256xf32> to vector<128x32xf32>
    %c0_14 = arith.constant 0 : index
    %c1 = arith.constant 1 : index
    %32 = vector.load %arg3[%c0_14, %c1] : memref<128x4xf32, #tpu.memory_space<vmem>>, vector<128x1xf32>
    %33 = vector.broadcast %32 : vector<128x1xf32> to vector<128x32xf32>
    %34 = arith.mulf %29, %33 : vector<128x32xf32>
    %35 = arith.mulf %27, %31 : vector<128x32xf32>
    %36 = arith.addf %34, %35 : vector<128x32xf32>
    %c0_15 = arith.constant 0 : index
    %c32 = arith.constant 32 : index
    %37 = vector.load %arg15[%c0_15, %c32] : memref<128x128xf32, #tpu.memory_space<vmem>>, vector<128x32xf32>
    tpu.vector_store %arg15[%c0_15, %c32], %36 {strides = array<i32>} : memref<128x128xf32, #tpu.memory_space<vmem>>, vector<128x32xf32>,
    %38 = vector.extract_strided_slice %16 {offsets = [0, 128], sizes = [128, 32], strides = [1, 1]} : vector<128x256xf32> to vector<128x32xf32>
    %c0_16 = arith.constant 0 : index
    %c2 = arith.constant 2 : index
    %39 = vector.load %arg3[%c0_16, %c2] : memref<128x4xf32, #tpu.memory_space<vmem>>, vector<128x1xf32>
    %40 = vector.broadcast %39 : vector<128x1xf32> to vector<128x32xf32>
    %41 = arith.mulf %29, %40 : vector<128x32xf32>
    %42 = arith.mulf %27, %38 : vector<128x32xf32>
    %43 = arith.addf %41, %42 : vector<128x32xf32>
    %c0_17 = arith.constant 0 : index
    %c64 = arith.constant 64 : index
    %44 = vector.load %arg15[%c0_17, %c64] : memref<128x128xf32, #tpu.memory_space<vmem>>, vector<128x32xf32>
    tpu.vector_store %arg15[%c0_17, %c64], %43 {strides = array<i32>} : memref<128x128xf32, #tpu.memory_space<vmem>>, vector<128x32xf32>,
    %45 = vector.extract_strided_slice %16 {offsets = [0, 160], sizes = [128, 32], strides = [1, 1]} : vector<128x256xf32> to vector<128x32xf32>
    %c0_18 = arith.constant 0 : index
    %c3 = arith.constant 3 : index
    %46 = vector.load %arg3[%c0_18, %c3] : memref<128x4xf32, #tpu.memory_space<vmem>>, vector<128x1xf32>
    %47 = vector.broadcast %46 : vector<128x1xf32> to vector<128x32xf32>
    %48 = arith.mulf %29, %47 : vector<128x32xf32>
    %49 = arith.mulf %27, %45 : vector<128x32xf32>
    %50 = arith.addf %48, %49 : vector<128x32xf32>
    %c0_19 = arith.constant 0 : index
    %c96 = arith.constant 96 : index
    %51 = vector.load %arg15[%c0_19, %c96] : memref<128x128xf32, #tpu.memory_space<vmem>>, vector<128x32xf32>
    tpu.vector_store %arg15[%c0_19, %c96], %50 {strides = array<i32>} : memref<128x128xf32, #tpu.memory_space<vmem>>, vector<128x32xf32>,
    %c0_20 = arith.constant 0 : index
    %c0_21 = arith.constant 0 : index
    %52 = vector.load %arg14[%c0_20, %c0_21] : memref<16x128xf32, #tpu.memory_space<vmem>>, vector<16x128xf32>
    %c0_22 = arith.constant 0 : index
    %c0_23 = arith.constant 0 : index
    %53 = vector.load %arg15[%c0_22, %c0_23] : memref<128x128xf32, #tpu.memory_space<vmem>>, vector<128x128xf32>
    %cst_24 = arith.constant dense<0.000000e+00> : vector<16x128xf32>
    %54 = tpu.matmul %14, %53, %cst_24 {dimension_numbers = #tpu.dot_dimension_numbers<[1], [0], [0], [1], [0, 0, 1, 1], [], []>} : vector<16x128xf32>, vector<128x128xf32>, vector<16x128xf32> -> vector<16x128xf32>
    %55 = arith.addf %52, %54 : vector<16x128xf32>
    %c0_25 = arith.constant 0 : index
    %c0_26 = arith.constant 0 : index
    %56 = vector.load %arg14[%c0_25, %c0_26] : memref<16x128xf32, #tpu.memory_space<vmem>>, vector<16x128xf32>
    tpu.vector_store %arg14[%c0_25, %c0_26], %55 {strides = array<i32>} : memref<16x128xf32, #tpu.memory_space<vmem>>, vector<16x128xf32>,
    %c0_i32_27 = arith.constant 0 : i32
    %57 = arith.cmpi eq, %arg1, %c0_i32_27 : i32
    %58 = arith.extui %57 : i1 to i32
    %c0_i32_28 = arith.constant 0 : i32
    %59 = arith.cmpi ne, %58, %c0_i32_28 : i32
    scf.if %59 {
      %c0_29 = arith.constant 0 : index
      %c0_30 = arith.constant 0 : index
      %60 = vector.load %arg14[%c0_29, %c0_30] : memref<16x128xf32, #tpu.memory_space<vmem>>, vector<16x128xf32>
      %c0_31 = arith.constant 0 : index
      %c0_32 = arith.constant 0 : index
      %c0_33 = arith.constant 0 : index
      %61 = vector.load %arg12[%c0_31, %c0_32, %c0_33] : memref<1x16x128xf32, #tpu.memory_space<vmem>>, vector<1x16x128xf32>
      %62 = vector.shape_cast %61 : vector<1x16x128xf32> to vector<16x128xf32>
      %63 = vector.shape_cast %60 : vector<16x128xf32> to vector<1x16x128xf32>
      tpu.vector_store %arg12[%c0_31, %c0_32, %c0_33], %63 {strides = array<i32>} : memref<1x16x128xf32, #tpu.memory_space<vmem>>, vector<1x16x128xf32>,
    } else {
    }
    return
  }
  func.func @transform_0(%arg0: i32, %arg1: i32) -> (i32, i32) {
    %c0_i32 = arith.constant 0 : i32
    %c0_i32_0 = arith.constant 0 : i32
    %c0_i32_1 = arith.constant 0 : i32
    return %c0_i32, %c0_i32_0 : i32, i32
  }
  func.func @transform_1(%arg0: i32, %arg1: i32) -> (i32, i32) {
    %c1_i32 = arith.constant 1 : i32
    %0 = arith.muli %arg0, %c1_i32 : i32
    %1 = arith.addi %0, %arg1 : i32
    %c0_i32 = arith.constant 0 : i32
    %c0_i32_0 = arith.constant 0 : i32
    return %1, %c0_i32 : i32, i32
  }
  func.func @transform_2(%arg0: i32, %arg1: i32) -> (i32, i32) {
    %c1_i32 = arith.constant 1 : i32
    %0 = arith.muli %arg0, %c1_i32 : i32
    %1 = arith.addi %0, %arg1 : i32
    %c0_i32 = arith.constant 0 : i32
    %c0_i32_0 = arith.constant 0 : i32
    return %1, %c0_i32 : i32, i32
  }
  func.func @transform_3(%arg0: i32, %arg1: i32) -> (i32, i32) {
    %c1_i32 = arith.constant 1 : i32
    %0 = arith.muli %arg0, %c1_i32 : i32
    %1 = arith.addi %0, %arg1 : i32
    %c0_i32 = arith.constant 0 : i32
    %c0_i32_0 = arith.constant 0 : i32
    return %c0_i32, %1 : i32, i32
  }
  func.func @transform_4(%arg0: i32, %arg1: i32) -> (i32, i32) {
    %c0_i32 = arith.constant 0 : i32
    %c0_i32_0 = arith.constant 0 : i32
    %c0_i32_1 = arith.constant 0 : i32
    return %c0_i32, %c0_i32_0 : i32, i32
  }
  func.func @transform_5(%arg0: i32, %arg1: i32) -> (i32, i32) {
    %c0_i32 = arith.constant 0 : i32
    %c0_i32_0 = arith.constant 0 : i32
    %c0_i32_1 = arith.constant 0 : i32
    return %c0_i32, %c0_i32_0 : i32, i32
  }
  func.func @transform_6(%arg0: i32, %arg1: i32) -> (i32, i32) {
    %c0_i32 = arith.constant 0 : i32
    %c0_i32_0 = arith.constant 0 : i32
    %c0_i32_1 = arith.constant 0 : i32
    return %c0_i32, %c0_i32_0 : i32, i32
  }
  func.func @transform_7(%arg0: i32, %arg1: i32) -> (i32, i32) {
    %c0_i32 = arith.constant 0 : i32
    %c0_i32_0 = arith.constant 0 : i32
    %c0_i32_1 = arith.constant 0 : i32
    return %c0_i32, %c0_i32_0 : i32, i32
  }
  func.func @transform_8(%arg0: i32, %arg1: i32) -> (i32, i32) {
    %c0_i32 = arith.constant 0 : i32
    %c0_i32_0 = arith.constant 0 : i32
    %c0_i32_1 = arith.constant 0 : i32
    return %c0_i32, %c0_i32_0 : i32, i32
  }
  func.func @transform_9(%arg0: i32, %arg1: i32) -> (i32, i32) {
    %c0_i32 = arith.constant 0 : i32
    %c0_i32_0 = arith.constant 0 : i32
    %c0_i32_1 = arith.constant 0 : i32
    return %c0_i32, %c0_i32_0 : i32, i32
  }
  func.func @transform_10(%arg0: i32, %arg1: i32) -> (i32, i32, i32) {
    %c0_i32 = arith.constant 0 : i32
    %c0_i32_0 = arith.constant 0 : i32
    %c0_i32_1 = arith.constant 0 : i32
    return %arg0, %c0_i32, %c0_i32_0 : i32, i32, i32
  }
}

</mosaic_0001>

<bundles_post_ra>
// kernel: tpu_custom_call.1
= control target key start
LH: loop header
LB: loop body
LE: loop exit
PB: predicated region body
PF: predicated region fallthrough
CT: control target
= control target key end

     0   :  { %s3844_s0 = inlined_call_operand.vmem [shape: f32[16,128], index: 0, kind: input, shape index: {}]   ;;  %s3845_s1 = inlined_call_operand.vmem [shape: f32[256,4], index: 1, kind: input, shape index: {}]   ;;  %s3846_s2 = inlined_call_operand.vmem [shape: s32[256,1], index: 2, kind: input, shape index: {}]   ;;  %s3847_s3 = inlined_call_operand.vmem [shape: s32[1,256], index: 3, kind: input, shape index: {}]   ;;  %s3848_s4 = inlined_call_operand.vmem [shape: f32[32,32], index: 4, kind: input, shape index: {}]   ;;  %s3849_s5 = inlined_call_operand.vmem [shape: f32[1,32], index: 5, kind: input, shape index: {}]   ;;  %s3850_s6 = inlined_call_operand.vmem [shape: f32[32,96], index: 6, kind: input, shape index: {}]   ;;  %s3851_s7 = inlined_call_operand.vmem [shape: f32[1,96], index: 7, kind: input, shape index: {}]   ;;  %s3852_s8 = inlined_call_operand.vmem [shape: f32[1,96], index: 8, kind: input, shape index: {}]   ;;  %s3853_s9 = inlined_call_operand.vmem [shape: f32[1,96], index: 9, kind: input, shape index: {}]   ;;  %s3854_s10 = inlined_call_operand.hbm [shape: f32[2,16,128], index: 10, kind: output, shape index: {}]  }
   0x1   :  { %3857 = sst [smem:[#allocation27_spill]] %s3844_s0 }
   0x2   :  { %15 = vsyncpa [#allocation6], 0 }
   0x3   :  { %17 = vsyncpa [#allocation6 + $0x1], 0  ;;  %s2743_s13 = smov 0   ;;  %s2745_s14 = smov 0  }
   0x4   :  { %s2747_s15 = smov 0   ;;  %s2749_s16 = smov 0  }
   0x5   :  { %s2751_s17 = smov 0   ;;  %s2753_s18 = smov 0  }
   0x6 LB: > { %s2367_s19 = sadd.s32 4294967295, %s2674_s18   ;;  %s2368_s20 = sadd.s32 4294967294, %s2674_s18   ;;  %s2674_s18 = sphi %s2753_s18, %s23_s18   ;;  %s2670_s17 = sphi %s2751_s17, %s3904_s17   ;;  %s2666_s16 = sphi %s2749_s16, %s3903_s16   ;;  %s2662_s15 = sphi %s2747_s15, %s3902_s15   ;;  %s2658_s14 = sphi %s2745_s14, %s3901_s14   ;;  %s2654_s13 = sphi %s2743_s13, %s3900_s13  }
   0x7   : > { %s35_s21 = sadd.s32 1, %s2670_s17  ;;  %s273_s22 = sadd.s32 1, %s2662_s15 }
   0x8   : > { %p37_p0 = scmp.ge.s32.totalorder %s35_s21, 2  ;;  %p283_p1 = scmp.ne.s32.totalorder %s2662_s15, %s2658_s14 }
   0x9   : > { %p284_p2 = scmp.eq.s32.totalorder %s2367_s19, 1  ;;  %p289_p3 = scmp.ne.s32.totalorder %s2658_s14, %s2654_s13 }
   0xa   : > { %s3906_s21 = smov (%p37_p0, %s35_s21), 0  ;;  %p290_p5 = scmp.eq.s32.totalorder %s2368_s20, 1 }
   0xb   : > { %p2783_p4 = por %p284_p2, %p283_p1  ;;  %s270_s24 = ssub.s32 %s2670_s17, %s3906_s21 }
   0xc   : > { %p2371_p6 = scmp.ge.s32.totalorder %s2674_s18, 1  ;;  %p271_p7 = scmp.eq.s32.totalorder %s270_s24, 0 }
   0xd   : > { %p2790_p8 = por %p290_p5, %p289_p3  ;;  %p359_p9 = scmp.lt.s32.totalorder %s2674_s18, 3 }
   0xe   : > { %s2796_s26 = scalar_select %p271_p7, %s2662_s15, %s273_s22  }
   0xf   : > { %p360_p10 = pnand %p2371_p6, %p359_p9 }
  0x11   : > { %363 = sbr.rel (%p360_p10) target bundleno = 1354 (0x54a), region = 60 }
  0x16   : > { %v438_v0 = vld [vmem:[%s3848_s4 + $0x18] sm:$0xff]  ;;  %v437_v1 = vld [vmem:[%s3848_s4 + $0x10] sm:$0xff]  ;;  %vm446_vm0 = vcmask 261120   ;;  %s3860_s0 = sld [smem:[#allocation27_spill]]  ;;  %v436_v3 = vld [vmem:[%s3848_s4 + $0x8] sm:$0xff]  ;;  %s2373_s27 = sshll.u32 %s2666_s16, 4 }
  0x17   : > { %2458 = vmatprep.subr.mxu1 %v438_v0  ;;  %v435_v4 = vld [vmem:[%s3848_s4] sm:$0xff]  ;;  %v533_v6 = vld [vmem:[%s3850_s6 + $0x18] sm:$0xff]  ;;  %v532_v7 = vld [vmem:[%s3850_s6 + $0x10] sm:$0xff]  ;;  %v2676_v10 = vmov 0   ;;  %p410_p11 = scmp.lt.s32.totalorder %s2373_s27, 31  ;;  %s2677_s28 = smov 64  }
  0x18   : > { %2459 = vmatpush3.msra.mxu1 %v438_v0  ;;  %v531_v8 = vld [vmem:[%s3850_s6 + $0x8] sm:$0xff]  ;;  %v530_v9 = vld [vmem:[%s3850_s6] sm:$0xff]  ;;  %2581 = vset.pattern.permute.xlu1 %v2676_v10  ;;  %v2678_v11 = vmov 0.0   ;;  %vm637_vm1 = vcmask 523264   ;;  %vm641_vm2 = vcmask 1048064   ;;  %vm622_vm3 = vcmask 785408  }
  0x19   : > { %2460 = vmatprep.subr.mxu1 %v437_v1  ;;  %2582 = vset.pattern.permute.xlu0 %v2676_v10  ;;  %s3908_s27 = smov (!%p410_p11, %s2373_s27), 31  ;;  %v2377_v44 = vld [vmem:[%s3849_s5] ss:$0 sm:$0xff]  ;;  %vm635_vm4 = vcmask 1048320   ;;  %vm778_vm6 = vcmask 130048   ;;  %s2682_s24 = smov 32  }
  0x1a   : > { %2461 = vmatpush3.msra.mxu1 %v437_v1  ;;  %891 = vmatprep.mubr.f32.mxu0 %v2678_v11  ;;  %s2374_s29 = sshll.u32 %s3908_s27, 3  ;;  %s2683_s27 = smov 96  }
  0x1b   : > { %2462 = vmatprep.subr.mxu1 %v436_v3  ;;  %s2842_s12 = scalar_lea.vmem %s3846_s2, %s2374_s29  ;;  %s2863_s22 = scalar_lea.vmem %s3845_s1, %s2374_s29 }
  0x1c   : > { %v433_v2 = vld [vmem:[%s3860_s0] sm:$0xff]  ;;  %2463 = vmatpush3.msra.mxu1 %v436_v3  ;;  %v434_v5 = vld [vmem:[%s3860_s0 + $0x8] sm:$0xff]  ;;  %v648_v13 = vld [vmem:[%s2842_s12 + $0x10] sm:$0xff]  ;;  %p425_p12 = scmp.lt.s32.totalorder %s2666_s16, 1 }
  0x1d   : > { %2466 = vmatprep.mubr.msk.f32.mxu1 %vm446_vm0, %v433_v2  ;;  %2464 = vmatprep.subr.mxu1 %v435_v4  ;;  %v646_v12 = vld [vmem:[%s2842_s12] sm:$0xff]  ;;  %v647_v14 = vld [vmem:[%s2842_s12 + $0x8] sm:$0xff]  ;;  %v649_v16 = vld [vmem:[%s2842_s12 + $0x18] sm:$0xff] }
  0x1e   : > { %2465 = vmatpush3.msra.mxu1 %v435_v4  ;;  %631 = vrot.lane.b32.xlu0 %v434_v5, %s2677_s28  ;;  %v651_v15 = vld [vmem:[%s2842_s12 + $0x28] sm:$0xff]  ;;  %v653_v17 = vld [vmem:[%s2842_s12 + $0x38] sm:$0xff]  ;;  %v650_v18 = vld [vmem:[%s2842_s12 + $0x20] sm:$0xff] }
  0x1f   : > { %2467 = vmatmul.mubr.msk.f32.vlgmr.msra.gmra.mxu1 %vm446_vm0, %v434_v5  ;;  %2469 = vmatprep.subr.mxu1 %v533_v6  ;;  %v655_v19 = vld [vmem:[%s2842_s12 + $0x48] sm:$0xff]  ;;  %v652_v20 = vld [vmem:[%s2842_s12 + $0x30] sm:$0xff]  ;;  %v657_v21 = vld [vmem:[%s2842_s12 + $0x58] sm:$0xff] }
  0x20   : > { %2470 = vmatpush3.msra.mxu1 %v533_v6  ;;  %666 = vperm.xlu1 %2581, %v646_v12   ;;  %v654_v22 = vld [vmem:[%s2842_s12 + $0x40] sm:$0xff]  ;;  %v659_v23 = vld [vmem:[%s2842_s12 + $0x68] sm:$0xff]  ;;  %v656_v24 = vld [vmem:[%s2842_s12 + $0x50] sm:$0xff] }
  0x21   : > { %2471 = vmatprep.subr.mxu1 %v532_v7  ;;  %v661_v25 = vld [vmem:[%s2842_s12 + $0x78] sm:$0xff]  ;;  %v658_v26 = vld [vmem:[%s2842_s12 + $0x60] sm:$0xff]  ;;  %v2867_v27 = vld [vmem:[%s2863_s22 + $0x8] sm:$0xff] }
  0x22   : > { %2472 = vmatpush3.msra.mxu1 %v532_v7  ;;  %629 = vrot.lane.b32.xlu0 %v433_v2, %s2677_s28  ;;  %v660_v28 = vld [vmem:[%s2842_s12 + $0x70] sm:$0xff]  ;;  %v2872_v29 = vld [vmem:[%s2863_s22 + $0x18] sm:$0xff]  ;;  %v2875_v30 = vld [vmem:[%s2863_s22] sm:$0xff] }
  0x23   : > { %2473 = vmatprep.subr.mxu1 %v531_v8  ;;  %v2879_v31 = vld [vmem:[%s2863_s22 + $0x28] sm:$0xff]  ;;  %v2883_v32 = vld [vmem:[%s2863_s22 + $0x10] sm:$0xff]  ;;  %v2887_v33 = vld [vmem:[%s2863_s22 + $0x38] sm:$0xff] }
  0x24   : > { %2474 = vmatpush3.msra.mxu1 %v531_v8  ;;  %669 = vperm.xlu1 %2581, %v647_v14   ;;  %v2891_v34 = vld [vmem:[%s2863_s22 + $0x20] sm:$0xff]  ;;  %v2895_v35 = vld [vmem:[%s2863_s22 + $0x48] sm:$0xff]  ;;  %v2899_v36 = vld [vmem:[%s2863_s22 + $0x30] sm:$0xff] }
  0x25   : > { %2475 = vmatprep.subr.mxu1 %v530_v9  ;;  %v2903_v37 = vld [vmem:[%s2863_s22 + $0x58] sm:$0xff]  ;;  %v2907_v38 = vld [vmem:[%s2863_s22 + $0x40] sm:$0xff]  ;;  %v2911_v39 = vld [vmem:[%s2863_s22 + $0x68] sm:$0xff] }
  0x26   : > { %2476 = vmatpush3.msra.mxu1 %v530_v9  ;;  %672 = vperm.xlu0 %2582, %v648_v13   ;;  %v2915_v40 = vld [vmem:[%s2863_s22 + $0x50] sm:$0xff]  ;;  %v2919_v41 = vld [vmem:[%s2863_s22 + $0x78] sm:$0xff]  ;;  %v2923_v42 = vld [vmem:[%s2863_s22 + $0x60] sm:$0xff] }
  0x27   : > { %v2928_v43 = vld [vmem:[%s2863_s22 + $0x70] sm:$0xff] }
  0x28   : > { %675 = vperm.xlu1 %2581, %v649_v16  }
  0x2a   : > { %681 = vperm.xlu0 %2582, %v651_v15  }
  0x2c   : > { %678 = vperm.xlu1 %2581, %v650_v18  }
  0x2e   : > { %687 = vperm.xlu0 %2582, %v653_v17  }
  0x30   : > { %684 = vperm.xlu1 %2581, %v652_v20  }
  0x32   : > { %693 = vperm.xlu0 %2582, %v655_v19   ;;  %v3001_v19 = vld [vmem:[%s3852_s8] ss:$0 sm:$0xff] }
  0x34   : > { %690 = vperm.xlu1 %2581, %v654_v22   ;;  %v2679_v22 = vmov 1  }
  0x36   : > { %699 = vperm.xlu0 %2582, %v657_v21  }
  0x38   : > { %696 = vperm.xlu1 %2581, %v656_v24  }
  0x3a   : > { %705 = vperm.xlu0 %2582, %v659_v23  }
  0x3c   : > { %702 = vperm.xlu1 %2581, %v658_v26  }
  0x3e   : > { %711 = vperm.xlu0 %2582, %v661_v25   ;;  %v3010_v25 = vld [vmem:[%s3853_s9] ss:$0 sm:$0xff] }
  0x40   : > { %708 = vperm.xlu1 %2581, %v660_v28  }
  0x42   : > { %1012 = vperm.xlu0 %2582, %v2867_v27  }
  0x44   : > { %1007 = vperm.xlu1 %2581, %v2875_v30  }
  0x46   : > { %1022 = vperm.xlu0 %2582, %v2872_v29  }
  0x48   : > { %1017 = vperm.xlu1 %2581, %v2883_v32  }
  0x4a   : > { %1032 = vperm.xlu0 %2582, %v2879_v31  }
  0x4c   : > { %1027 = vperm.xlu1 %2581, %v2891_v34  }
  0x4e   : > { %1042 = vperm.xlu0 %2582, %v2887_v33  }
  0x50   : > { %1037 = vperm.xlu1 %2581, %v2899_v36  }
  0x52   : > { %1052 = vperm.xlu0 %2582, %v2895_v35  }
  0x54   : > { %1047 = vperm.xlu1 %2581, %v2907_v38  }
  0x56   : > { %1062 = vperm.xlu0 %2582, %v2903_v37  }
  0x58   : > { %1057 = vperm.xlu1 %2581, %v2915_v40  }
  0x5a   : > { %1072 = vperm.xlu0 %2582, %v2911_v39  }
  0x5c   : > { %1067 = vperm.xlu1 %2581, %v2923_v42  }
  0x5e   : > { %1082 = vperm.xlu0 %2582, %v2919_v41  }
  0x60   : > { %1077 = vperm.xlu1 %2581, %v2928_v43  }
  0x62   : > { %2584 = vset.pattern.permute.xlu0 %v2679_v22 }
  0x63   : > { %1315 = vperm.xlu0 %2584, %v2928_v43  }
  0x64   : > { %2583 = vset.pattern.permute.xlu1 %v2679_v22 }
  0x65   : > { %1320 = vperm.xlu1 %2583, %v2919_v41  }
  0x90   : > { %v2934_v49 = vpop.permute.xlu0 %631 }
  0x91   : > { %640 = vst.msk [vmem:[#allocation2 + $0x18] sm:$0xff] %vm637_vm1, %v2934_v49 }
  0x92   : > { %643 = vst.msk [vmem:[#allocation2 + $0x18] sm:$0xff] %vm641_vm2, %v2678_v11 }
  0x94   : > { %v2938_v50 = vpop.permute.xlu0 %629 }
  0x95   : > { %638 = vst.msk [vmem:[#allocation2 + $0x8] sm:$0xff] %vm637_vm1, %v2938_v50 }
  0x96   : > { %642 = vst.msk [vmem:[#allocation2 + $0x8] sm:$0xff] %vm641_vm2, %v2678_v11 }
  0x99   : > { %v777_v16 = vld [vmem:[#allocation2 + $0x18] sm:$0xff] }
  0x9a   : > { %855 = vmatprep.subr.mxu0 %v777_v16 }
  0x9b   : > { %v2944_v53 = vpop.permute.xlu1 %666 }
  0x9f   : > { %v2946_v54 = vpop.permute.xlu1 %669 }
  0xa1   : > { %v2948_v55 = vpop.permute.xlu0 %672 }
  0xa3   : > { %v2950_v56 = vpop.permute.xlu1 %675 }
  0xa5   : > { %v2954_v58 = vpop.permute.xlu0 %681 }
  0xa7   : > { %v2952_v57 = vpop.permute.xlu1 %678 }
  0xa9   : > { %v2958_v60 = vpop.permute.xlu0 %687 }
  0xab   : > { %v2956_v59 = vpop.permute.xlu1 %684 }
  0xad   : > { %v2964_v63 = vpop.permute.xlu0 %693 }
  0xaf   : > { %v2960_v61 = vpop.permute.xlu1 %690 }
  0xb1   : > { %v2968_v1 = vpop.permute.xlu0 %699 }
  0xb3   : > { %v2962_v62 = vpop.permute.xlu1 %696 }
  0xb5   : > { %v2972_v3 = vpop.permute.xlu0 %705 }
  0xb7   : > { %v2966_v0 = vpop.permute.xlu1 %702 }
  0xb9   : > { %v2976_v5 = vpop.permute.xlu0 %711 }
  0xbb   : > { %v2970_v2 = vpop.permute.xlu1 %708 }
  0xbd   : > { %v2980_v7 = vpop.permute.xlu0 %1012 }
  0xbf   : > { %v2974_v4 = vpop.permute.xlu1 %1007 }
  0xc1   : > { %v2984_v9 = vpop.permute.xlu0 %1022 }
  0xc3   : > { %v2978_v6 = vpop.permute.xlu1 %1017 }
  0xc5   : > { %v2988_v12 = vpop.permute.xlu0 %1032 }
  0xc7   : > { %v2982_v8 = vpop.permute.xlu1 %1027 }
  0xc9   : > { %v2992_v14 = vpop.permute.xlu0 %1042 }
  0xcb   : > { %v2986_v10 = vpop.permute.xlu1 %1037 }
  0xcd   : > { %v2996_v17 = vpop.permute.xlu0 %1052 }
  0xcf   : > { %v2990_v13 = vpop.permute.xlu1 %1047 }
  0xd1   : > { %v1063_v21 = vpop.permute.xlu0 %1062 }
  0xd3   : > { %v2994_v15 = vpop.permute.xlu1 %1057 }
  0xd5   : > { %v1073_v26 = vpop.permute.xlu0 %1072 }
  0xd7   : > { %v1068_v18 = vpop.permute.xlu1 %1067 }
  0xd8   : > { %v1103_v20 = vmul.f32 %v3001_v19, %v1068_v18 }
  0xda   : > { %v3013_v28 = vadd.f32 %v3010_v25, %v1103_v20  ;;  %v2681_v20 = vmov 2  }
  0xdb   : > { %v1078_v23 = vpop.permute.xlu1 %1077 }
  0xdc   : > { %v1105_v24 = vmul.f32 %v3001_v19, %v1078_v23  ;;  %v1092_v23 = vmul.f32 %v3001_v19, %v2980_v7 }
  0xdf   : > { %v2468_v45 = vpop.f32.mrf.mxu1 }
  0xe0   : > { %v525_v46 = vadd.f32 %v2468_v45, %v2377_v44  ;;  %v3016_v45 = vadd.f32 %v3010_v25, %v1105_v24 }
  0xe1   : > { %v519_v47 = vpop.f32.mrf.mxu1 }
  0xe2   : > { %v520_v48 = vadd.f32 %v2377_v44, %v519_v47  ;;  %v2680_v44 = vmov 3   ;;  %v1104_v47 = vmul.f32 %v3001_v19, %v1073_v26 }
  0xe3   : > { %2585 = vset.pattern.permute.xlu1 %v2680_v44  ;;  %2587 = vset.pattern.permute.xlu0 %v2680_v44 }
  0xe4   : > { %2594 = vtanh.f32 %v520_v48  ;;  %1898 = vperm.xlu1 %2585, %v2919_v41   ;;  %1893 = vperm.xlu0 %2587, %v2928_v43   ;;  %v1083_v48 = vpop.permute.xlu0 %1082  ;;  %v3029_v16 = vadd.f32 %v3010_v25, %v1104_v47 }
  0xe5   : > { %2596 = vtanh.f32 %v525_v46  ;;  %v1102_v46 = vmul.f32 %v3001_v19, %v1063_v21 }
  0xe8   : > { %2586 = vset.pattern.permute.xlu1 %v2679_v22  ;;  %1883 = vperm.xlu0 %2587, %v2923_v42  }
  0xe9   : > { %1310 = vperm.xlu1 %2586, %v2911_v39  }
  0xec   : > { %1878 = vperm.xlu0 %2587, %v2903_v37  }
  0xed   : > { %1305 = vperm.xlu1 %2586, %v2923_v42  }
  0xf0   : > { %1873 = vperm.xlu0 %2587, %v2915_v40  }
  0xf1   : > { %v2595_v51 = vpop.eup %2594  ;;  %2588 = vset.pattern.permute.xlu1 %v2680_v44 }
  0xf2   : > { %v2597_v52 = vpop.eup %2596  ;;  %2477 = vmatprep.mubr.msk.f32.mxu1 %vm446_vm0, %v2595_v51  ;;  %v1106_v51 = vmul.f32 %v3001_v19, %v1083_v48  ;;  %1888 = vperm.xlu1 %2588, %v2911_v39  }
  0xf3   : > { %2478 = vmatmul.mubr.msk.f32.vlgmr.msra.gmra.mxu1 %vm446_vm0, %v2597_v52  ;;  %v3026_v52 = vadd.f32 %v3010_v25, %v1102_v46  ;;  %v1115_v46 = vadd.f32 %v3010_v25, %v1092_v23 }
  0xf4   : > { %v3032_v18 = vadd.f32 %v3010_v25, %v1106_v51  ;;  %1868 = vperm.xlu0 %2587, %v2895_v35  }
  0xf6   : > { %2589 = vset.pattern.permute.xlu1 %v2679_v22  ;;  %v1093_v22 = vmul.f32 %v3001_v19, %v2978_v6 }
  0xf7   : > { %1300 = vperm.xlu1 %2589, %v2903_v37  }
  0xf8   : > { %1863 = vperm.xlu0 %2587, %v2907_v38   ;;  %v1116_v6 = vadd.f32 %v3010_v25, %v1093_v22  ;;  %v1098_v22 = vmul.f32 %v3001_v19, %v2992_v14 }
  0xfb   : > { %1295 = vperm.xlu1 %2589, %v2915_v40  }
  0xfc   : > { %1858 = vperm.xlu0 %2587, %v2887_v33  }
  0xff   : > { %1290 = vperm.xlu1 %2589, %v2895_v35  }
 0x100   : > { %1853 = vperm.xlu0 %2587, %v2899_v36  }
 0x103   : > { %1285 = vperm.xlu1 %2589, %v2907_v38  }
 0x104   : > { %1848 = vperm.xlu0 %2587, %v2879_v31  }
 0x107   : > { %1280 = vperm.xlu1 %2589, %v2887_v33  }
 0x108   : > { %1843 = vperm.xlu0 %2587, %v2891_v34  }
 0x10b   : > { %1275 = vperm.xlu1 %2589, %v2899_v36  }
 0x10c   : > { %1838 = vperm.xlu0 %2587, %v2872_v29  }
 0x10f   : > { %1270 = vperm.xlu1 %2589, %v2879_v31  }
 0x110   : > { %1833 = vperm.xlu0 %2587, %v2883_v32  }
 0x113   : > { %1265 = vperm.xlu1 %2589, %v2891_v34  }
 0x114   : > { %1828 = vperm.xlu0 %2587, %v2867_v27  }
 0x117   : > { %1260 = vperm.xlu1 %2589, %v2872_v29  }
 0x118   : > { %2592 = vset.pattern.permute.xlu0 %v2681_v20 }
 0x119   : > { %1668 = vperm.xlu0 %2592, %v2928_v43  }
 0x11b   : > { %1255 = vperm.xlu1 %2589, %v2883_v32  }
 0x11d   : > { %1653 = vperm.xlu0 %2592, %v2903_v37  }
 0x11f   : > { %1250 = vperm.xlu1 %2589, %v2867_v27   ;;  %v2380_v27 = vld [vmem:[%s3851_s7] ss:$0 sm:$0xff] }
 0x121   : > { %2593 = vset.pattern.permute.xlu0 %v2680_v44 }
 0x123   : > { %1245 = vperm.xlu1 %2589, %v2875_v30  }
 0x127   : > { %2590 = vset.pattern.permute.xlu1 %v2680_v44 }
 0x128   : > { %1823 = vperm.xlu1 %2590, %v2875_v30   ;;  %v3855_v30 = vlaneseq }
 0x12a   : > { %v3074_v34 = vand.u32 127, %v3855_v30 }
 0x12c   : > { %2591 = vset.pattern.permute.xlu1 %v2681_v20  ;;  %vm713_vm5 = vcmp.eq.s32.totalorder %v3074_v34, %v2944_v53  ;;  %vm714_vm7 = vcmp.eq.s32.totalorder %v3074_v34, %v2946_v54  ;;  %vm715_vm8 = vcmp.eq.s32.totalorder %v3074_v34, %v2948_v55  ;;  %vm716_vm9 = vcmp.eq.s32.totalorder %v3074_v34, %v2950_v56 }
 0x12d   : > { %1673 = vperm.xlu1 %2591, %v2919_v41   ;;  %v2383_v37 = vsel %vm713_vm5, 1.0, %v2678_v11  ;;  %v2386_v41 = vsel %vm716_vm9, 1.0, %v2678_v11  ;;  %vm717_vm10 = vcmp.eq.s32.totalorder %v3074_v34, %v2952_v57  ;;  %vm718_vm11 = vcmp.eq.s32.totalorder %v3074_v34, %v2954_v58 }
 0x12e   : > { %v2388_v43 = vsel %vm718_vm11, 1.0, %v2678_v11  ;;  %vm719_vm12 = vcmp.eq.s32.totalorder %v3074_v34, %v2956_v59  ;;  %vm720_vm13 = vcmp.eq.s32.totalorder %v3074_v34, %v2958_v60  ;;  %vm721_vm14 = vcmp.eq.s32.totalorder %v3074_v34, %v2960_v61  ;;  %v3157_v61 = vpop.permute.xlu1 %1320 }
 0x12f   : > { %v2391_v53 = vsel %vm721_vm14, 1.0, %v2678_v11  ;;  %vm722_vm15 = vcmp.eq.s32.totalorder %v3074_v34, %v2964_v63  ;;  %vm723_vm1 = vcmp.eq.s32.totalorder %v3074_v34, %v2962_v62  ;;  %vm724_vm2 = vcmp.eq.s32.totalorder %v3074_v34, %v2968_v1 }
 0x130   : > { %v2392_v54 = vsel %vm722_vm15, 1.0, %v2678_v11  ;;  %v2393_v55 = vsel %vm723_vm1, 1.0, %v2678_v11  ;;  %v2394_v56 = vsel %vm724_vm2, 1.0, %v2678_v11  ;;  %vm726_vm5 = vcmp.eq.s32.totalorder %v3074_v34, %v2972_v3 }
 0x131   : > { %1663 = vperm.xlu1 %2591, %v2911_v39   ;;  %v2384_v39 = vsel %vm714_vm7, 1.0, %v2678_v11  ;;  %v2396_v58 = vsel %vm726_vm5, 1.0, %v2678_v11  ;;  %vm727_vm7 = vcmp.eq.s32.totalorder %v3074_v34, %v2970_v2  ;;  %vm1563_vm9 = vcmask 523520  }
 0x132   : > { %v2397_v59 = vsel %vm727_vm7, 1.0, %v2678_v11 }
 0x135   : > { %1658 = vperm.xlu1 %2591, %v2923_v42   ;;  %v2387_v42 = vsel %vm717_vm10, 1.0, %v2678_v11  ;;  %vm1788_vm10 = vcmask 785920  }
 0x139   : > { %1648 = vperm.xlu1 %2591, %v2915_v40   ;;  %v2385_v40 = vsel %vm715_vm8, 1.0, %v2678_v11  ;;  %vm728_vm8 = vcmp.eq.s32.totalorder %v3074_v34, %v2976_v5 }
 0x13a   : > { %v2398_v60 = vsel %vm728_vm8, 1.0, %v2678_v11 }
 0x13d   : > { %1643 = vperm.xlu1 %2591, %v2895_v35   ;;  %v775_v35 = vld [vmem:[#allocation2 + $0x8] sm:$0xff] }
 0x141   : > { %1638 = vperm.xlu1 %2591, %v2907_v38  }
 0x15f   : > { %v3159_v62 = vpop.permute.xlu1 %1898 }
 0x164   : > { %v3161_v63 = vpop.permute.xlu1 %1310 }
 0x168   : > { %v3165_v1 = vpop.permute.xlu1 %1305 }
 0x16d   : > { %v3168_v5 = vpop.permute.xlu1 %1888 }
 0x172   : > { %v3185_v26 = vpop.permute.xlu1 %1300 }
 0x176   : > { %v3200_v20 = vpop.permute.xlu1 %1295 }
 0x1b3   : > { %v2479_v29 = vpop.f32.mrf.mxu1 }
 0x1b4   : > { %v619_v31 = vadd.f32 %v2479_v29, %v2380_v27  ;;  %v1095_v29 = vmul.f32 %v3001_v19, %v2982_v8 }
 0x1b5   : > { %v613_v32 = vpop.f32.mrf.mxu1 }
 0x1b6   : > { %624 = vst.msk [vmem:[#allocation2 + $0x10] sm:$0xff] %vm622_vm3, %v619_v31  ;;  %v614_v33 = vadd.f32 %v2380_v27, %v613_v32  ;;  %v1094_v32 = vmul.f32 %v3001_v19, %v2984_v9  ;;  %v3226_v9 = vpop.permute.xlu0 %1315 }
 0x1b7   : > { %639 = vst.msk [vmem:[#allocation2 + $0x10] sm:$0xff] %vm635_vm4, %v2934_v49  ;;  %v2389_v49 = vsel %vm719_vm12, 1.0, %v2678_v11 }
 0x1b8   : > { %623 = vst.msk [vmem:[#allocation2] sm:$0xff] %vm622_vm3, %v614_v33  ;;  %vm725_vm3 = vcmp.eq.s32.totalorder %v3074_v34, %v2966_v0  ;;  %v1091_v0 = vmul.f32 %v3001_v19, %v2974_v4  ;;  %v3215_v34 = vpop.permute.xlu1 %1290  ;;  %v1117_v8 = vadd.f32 %v3010_v25, %v1094_v32  ;;  %v1101_v32 = vmul.f32 %v3001_v19, %v2994_v15 }
 0x1b9   : > { %636 = vst.msk [vmem:[#allocation2] sm:$0xff] %vm635_vm4, %v2938_v50  ;;  %v2390_v50 = vsel %vm720_vm13, 1.0, %v2678_v11  ;;  %v2395_v57 = vsel %vm725_vm3, 1.0, %v2678_v11 }
 0x1ba   : > { %v1114_v2 = vadd.f32 %v3010_v25, %v1091_v0 }
 0x1be   : > { %v776_v36 = vld [vmem:[#allocation2 + $0x10] sm:$0xff] }
 0x1bf   : > { %856 = vmatpush1.msra.mxu0 %v776_v36 }
 0x1c0   : > { %857 = vmatprep.subr.mxu0 %v775_v35  ;;  %v774_v38 = vld [vmem:[#allocation2] sm:$0xff]  ;;  %v1118_v35 = vadd.f32 %v3010_v25, %v1095_v29 }
 0x1c1   : > { %858 = vmatpush1.msra.mxu0 %v774_v38 }
 0x1c2   : > { %2402 = vmatmul.mubr.msk.f32.vlgmr.msra.gmra.mxu0 %vm778_vm6, %v2383_v37 }
 0x1c3   : > { %897 = vmatprep.mubr.f32.mxu0 %v2678_v11 }
 0x1c6   : > { %2403 = vmatmul.mubr.msk.f32.gmra.mxu0 %vm778_vm6, %v2384_v39 }
 0x1c7   : > { %903 = vmatprep.mubr.f32.mxu0 %v2678_v11 }
 0x1ca   : > { %2404 = vmatmul.mubr.msk.f32.gmra.mxu0 %vm778_vm6, %v2385_v40 }
 0x1cb   : > { %909 = vmatprep.mubr.f32.mxu0 %v2678_v11 }
 0x1ce   : > { %2405 = vmatmul.mubr.msk.f32.gmra.mxu0 %vm778_vm6, %v2386_v41  ;;  %v3232_v41 = vpop.permute.xlu1 %1285 }
 0x1cf   : > { %915 = vmatprep.mubr.f32.mxu0 %v2678_v11 }
 0x1d2   : > { %2406 = vmatmul.mubr.msk.f32.gmra.mxu0 %vm778_vm6, %v2387_v42 }
 0x1d3   : > { %921 = vmatprep.mubr.f32.mxu0 %v2678_v11 }
 0x1d6   : > { %2407 = vmatmul.mubr.msk.f32.gmra.mxu0 %vm778_vm6, %v2388_v43  ;;  %v1097_v43 = vmul.f32 %v3001_v19, %v2986_v10 }
 0x1d7   : > { %927 = vmatprep.mubr.f32.mxu0 %v2678_v11 }
 0x1da   : > { %2408 = vmatmul.mubr.msk.f32.gmra.mxu0 %vm778_vm6, %v2389_v49 }
 0x1db   : > { %933 = vmatprep.mubr.f32.mxu0 %v2678_v11 }
 0x1de   : > { %2409 = vmatmul.mubr.msk.f32.gmra.mxu0 %vm778_vm6, %v2390_v50  ;;  %v1096_v50 = vmul.f32 %v3001_v19, %v2988_v12 }
 0x1df   : > { %939 = vmatprep.mubr.f32.mxu0 %v2678_v11 }
 0x1e2   : > { %2410 = vmatmul.mubr.msk.f32.gmra.mxu0 %vm778_vm6, %v2391_v53  ;;  %v3244_v53 = vpop.permute.xlu0 %1893 }
 0x1e3   : > { %945 = vmatprep.mubr.f32.mxu0 %v2678_v11 }
 0x1e6   : > { %2411 = vmatmul.mubr.msk.f32.gmra.mxu0 %vm778_vm6, %v2392_v54  ;;  %v3258_v12 = vpop.permute.xlu0 %1883 }
 0x1e7   : > { %951 = vmatprep.mubr.f32.mxu0 %v2678_v11 }
 0x1ea   : > { %2412 = vmatmul.mubr.msk.f32.gmra.mxu0 %vm778_vm6, %v2393_v55  ;;  %v3249_v55 = vpop.permute.xlu1 %1280 }
 0x1eb   : > { %957 = vmatprep.mubr.f32.mxu0 %v2678_v11 }
 0x1ee   : > { %2413 = vmatmul.mubr.msk.f32.gmra.mxu0 %vm778_vm6, %v2394_v56  ;;  %v1120_v56 = vadd.f32 %v3010_v25, %v1097_v43  ;;  %v3266_v0 = vpop.permute.xlu1 %1275  ;;  %v1124_v43 = vadd.f32 %v3010_v25, %v1101_v32 }
 0x1ef   : > { %963 = vmatprep.mubr.f32.mxu0 %v2678_v11 }
 0x1f2   : > { %2414 = vmatmul.mubr.msk.f32.gmra.mxu0 %vm778_vm6, %v2395_v57  ;;  %v1119_v57 = vadd.f32 %v3010_v25, %v1096_v50  ;;  %v3279_v23 = vpop.permute.xlu1 %1270 }
 0x1f3   : > { %969 = vmatprep.mubr.f32.mxu0 %v2678_v11 }
 0x1f6   : > { %2415 = vmatmul.mubr.msk.f32.gmra.mxu0 %vm778_vm6, %v2396_v58 }
 0x1f7   : > { %975 = vmatprep.mubr.f32.mxu0 %v2678_v11 }
 0x1fa   : > { %2416 = vmatmul.mubr.msk.f32.gmra.mxu0 %vm778_vm6, %v2397_v59 }
 0x1fb   : > { %981 = vmatprep.mubr.f32.mxu0 %v2678_v11 }
 0x1fe   : > { %2417 = vmatmul.mubr.msk.f32.gmra.mxu0 %vm778_vm6, %v2398_v60 }
 0x282   : > { %v893_v3 = vpop.f32.mrf.mxu0 }
 0x283   : > { %v3170_v21 = vmul.f32 %v1114_v2, %v893_v3  ;;  %1355 = vrot.lane.b32.xlu0 %v893_v3, %s2682_s24  ;;  %v1099_v2 = vmul.f32 %v3001_v19, %v2990_v13  ;;  %v1121_v13 = vadd.f32 %v3010_v25, %v1098_v22 }
 0x284   : > { %v3173_v11 = vpop.f32.mrf.mxu0 }
 0x285   : > { %3861 = vst [vmem:[#allocation8_spill] sm:$0xff] %v3173_v11  ;;  %1162 = vrot.lane.b32.xlu1 %v3170_v21, %s2683_s27 }
 0x286   : > { %v899_v4 = vpop.f32.mrf.mxu0 }
 0x287   : > { %1933 = vrot.lane.b32.xlu0 %v3173_v11, %s2683_s27  ;;  %v3196_v48 = vmul.f32 %v1115_v46, %v899_v4 }
 0x288   : > { %v3183_v24 = vpop.f32.mrf.mxu0 }
 0x289   : > { %1935 = vrot.lane.b32.xlu1 %v3183_v24, %s2683_s27 }
 0x28a   : > { %v905_v44 = vpop.f32.mrf.mxu0 }
 0x28b   : > { %v3191_v47 = vmul.f32 %v1116_v6, %v905_v44  ;;  %1357 = vrot.lane.b32.xlu0 %v899_v4, %s2682_s24  ;;  %v3276_v4 = vpop.permute.xlu0 %1878  ;;  %v1122_v6 = vadd.f32 %v3010_v25, %v1099_v2 }
 0x28c   : > { %v3194_v7 = vpop.f32.mrf.mxu0 }
 0x28d   : > { %1166 = vrot.lane.b32.xlu1 %v3191_v47, %s2683_s27 }
 0x28e   : > { %v911_v51 = vpop.f32.mrf.mxu0 }
 0x28f   : > { %1164 = vrot.lane.b32.xlu0 %v3196_v48, %s2683_s27  ;;  %v3228_v39 = vmul.f32 %v1117_v8, %v911_v51  ;;  %v3290_v14 = vpop.permute.xlu0 %1873 }
 0x290   : > { %v3204_v27 = vpop.f32.mrf.mxu0 }
 0x291   : > { %1937 = vrot.lane.b32.xlu1 %v3194_v7, %s2683_s27 }
 0x292   : > { %v917_v31 = vpop.f32.mrf.mxu0 }
 0x293   : > { %1359 = vrot.lane.b32.xlu0 %v905_v44, %s2682_s24  ;;  %v3221_v37 = vmul.f32 %v1118_v35, %v917_v31  ;;  %v3308_v8 = vpop.permute.xlu0 %1868 }
 0x294   : > { %v3213_v33 = vpop.f32.mrf.mxu0 }
 0x295   : > { %1939 = vrot.lane.b32.xlu1 %v3204_v27, %s2683_s27 }
 0x296   : > { %v923_v36 = vpop.f32.mrf.mxu0 }
 0x297   : > { %1361 = vrot.lane.b32.xlu0 %v911_v51, %s2682_s24  ;;  %v3260_v59 = vmul.f32 %v1119_v57, %v923_v36 }
 0x298   : > { %v3224_v38 = vpop.f32.mrf.mxu0 }
 0x299   : > { %1170 = vrot.lane.b32.xlu1 %v3221_v37, %s2683_s27 }
 0x29a   : > { %v929_v40 = vpop.f32.mrf.mxu0 }
 0x29b   : > { %1168 = vrot.lane.b32.xlu0 %v3228_v39, %s2683_s27  ;;  %v3255_v58 = vmul.f32 %v1120_v56, %v929_v40  ;;  %v3320_v56 = vpop.permute.xlu0 %1863 }
 0x29c   : > { %v3236_v42 = vpop.f32.mrf.mxu0 }
 0x29d   : > { %1941 = vrot.lane.b32.xlu1 %v3213_v33, %s2683_s27 }
 0x29e   : > { %v935_v49 = vpop.f32.mrf.mxu0 }
 0x29f   : > { %1363 = vrot.lane.b32.xlu0 %v917_v31, %s2682_s24  ;;  %v3292_v51 = vmul.f32 %v1121_v13, %v935_v49  ;;  %v3296_v31 = vpop.permute.xlu1 %1265  ;;  %v3332_v57 = vpop.permute.xlu0 %1858 }
 0x2a0   : > { %v3247_v54 = vpop.f32.mrf.mxu0 }
 0x2a1   : > { %1943 = vrot.lane.b32.xlu1 %v3224_v38, %s2683_s27 }
 0x2a2   : > { %v941_v10 = vpop.f32.mrf.mxu0 }
 0x2a3   : > { %1365 = vrot.lane.b32.xlu0 %v923_v36, %s2682_s24  ;;  %v3287_v46 = vmul.f32 %v1122_v6, %v941_v10  ;;  %v1100_v36 = vmul.f32 %v3001_v19, %v2996_v17  ;;  %v3343_v13 = vpop.permute.xlu0 %1853 }
 0x2a4   : > { %v3264_v60 = vpop.f32.mrf.mxu0 }
 0x2a5   : > { %1174 = vrot.lane.b32.xlu1 %v3255_v58, %s2683_s27 }
 0x2a6   : > { %v947_v3 = vpop.f32.mrf.mxu0 }
 0x2a7   : > { %1172 = vrot.lane.b32.xlu0 %v3260_v59, %s2683_s27 }
 0x2a8   : > { %v3284_v44 = vpop.f32.mrf.mxu0 }
 0x2a9   : > { %1945 = vrot.lane.b32.xlu1 %v3236_v42, %s2683_s27 }
 0x2aa   : > { %v953_v29 = vpop.f32.mrf.mxu0 }
 0x2ab   : > { %1367 = vrot.lane.b32.xlu0 %v929_v40, %s2682_s24  ;;  %v3311_v40 = vpop.permute.xlu1 %1260  ;;  %v3317_v50 = vmul.f32 %v1124_v43, %v953_v29  ;;  %v3355_v43 = vpop.permute.xlu0 %1848 }
 0x2ac   : > { %v3304_v35 = vpop.f32.mrf.mxu0 }
 0x2ad   : > { %1947 = vrot.lane.b32.xlu1 %v3247_v54, %s2683_s27 }
 0x2ae   : > { %v959_v15 = vpop.f32.mrf.mxu0 }
 0x2af   : > { %1369 = vrot.lane.b32.xlu0 %v935_v49, %s2682_s24  ;;  %v1123_v49 = vadd.f32 %v3010_v25, %v1100_v36  ;;  %v3335_v2 = vmul.f32 %v3026_v52, %v959_v15 }
 0x2b0   : > { %v961_v19 = vpop.f32.mrf.mxu0 }
 0x2b1   : > { %1178 = vrot.lane.b32.xlu1 %v3287_v46, %s2683_s27  ;;  %v3322_v17 = vmul.f32 %v1123_v49, %v947_v3  ;;  %v1703_v6 = vmul.f32 %v3335_v2, %v961_v19 }
 0x2b2   : > { %v965_v25 = vpop.f32.mrf.mxu0 }
 0x2b3   : > { %1176 = vrot.lane.b32.xlu0 %v3292_v51, %s2683_s27  ;;  %v3349_v52 = vmul.f32 %v3013_v28, %v965_v25  ;;  %v3363_v28 = vpop.permute.xlu0 %1843 }
 0x2b4   : > { %v967_v22 = vpop.f32.mrf.mxu0 }
 0x2b5   : > { %1949 = vrot.lane.b32.xlu1 %v3264_v60, %s2683_s27 }
 0x2b6   : > { %v971_v32 = vpop.f32.mrf.mxu0 }
 0x2b7   : > { %1371 = vrot.lane.b32.xlu0 %v941_v10, %s2682_s24  ;;  %v3326_v10 = vpop.permute.xlu1 %1255  ;;  %v3368_v30 = vmul.f32 %v3029_v16, %v971_v32 }
 0x2b9   : > { %1951 = vrot.lane.b32.xlu1 %v3284_v44, %s2683_s27 }
 0x2bb   : > { %1373 = vrot.lane.b32.xlu0 %v947_v3, %s2682_s24  ;;  %v3338_v3 = vpop.permute.xlu1 %1250 }
 0x2bc   : > { %3862 = vst [vmem:[#allocation9_spill] sm:$0xff] %v3338_v3 }
 0x2bd   : > { %1182 = vrot.lane.b32.xlu1 %v3317_v50, %s2683_s27 }
 0x2bf   : > { %1180 = vrot.lane.b32.xlu0 %v3322_v17, %s2683_s27  ;;  %v3346_v36 = vpop.permute.xlu1 %1245 }
 0x2c0   : > { %3863 = vst [vmem:[#allocation10_spill] sm:$0xff] %v3346_v36 }
 0x2c1   : > { %1953 = vrot.lane.b32.xlu1 %v3304_v35, %s2683_s27 }
 0x2c3   : > { %1375 = vrot.lane.b32.xlu0 %v953_v29, %s2682_s24  ;;  %v973_v29 = vpop.f32.mrf.mxu0 }
 0x2c4   : > { %v1705_v3 = vmul.f32 %v3368_v30, %v973_v29 }
 0x2c5   : > { %1955 = vrot.lane.b32.xlu1 %v961_v19, %s2683_s27  ;;  %v977_v49 = vpop.f32.mrf.mxu0  ;;  %v1704_v19 = vmul.f32 %v3349_v52, %v967_v22 }
 0x2c7   : > { %1377 = vrot.lane.b32.xlu0 %v959_v15, %s2682_s24  ;;  %v3358_v15 = vpop.permute.xlu1 %1823  ;;  %v979_v11 = vpop.f32.mrf.mxu0 }
 0x2c8   : > { %3864 = vst [vmem:[#allocation11_spill] sm:$0xff] %v3358_v15  ;;  %v3374_v15 = vpop.permute.xlu0 %1838 }
 0x2c9   : > { %1746 = vrot.lane.b32.xlu1 %v1703_v6, %s2677_s28  ;;  %3866 = vst [vmem:[#allocation13_spill] sm:$0xff] %v3374_v15 }
 0x2cb   : > { %1184 = vrot.lane.b32.xlu0 %v3335_v2, %s2683_s27  ;;  %v3365_v6 = vpop.permute.xlu1 %1673 }
 0x2cc   : > { %3865 = vst [vmem:[#allocation12_spill] sm:$0xff] %v3365_v6  ;;  %v3389_v6 = vpop.permute.xlu0 %1833 }
 0x2cd   : > { %1186 = vrot.lane.b32.xlu1 %v3349_v52, %s2683_s27 }
 0x2cf   : > { %1379 = vrot.lane.b32.xlu0 %v965_v25, %s2682_s24  ;;  %v983_v25 = vpop.f32.mrf.mxu0 }
 0x2d0   : > { %v3381_v16 = vmul.f32 %v3032_v18, %v983_v25  ;;  %v3398_v18 = vpop.permute.xlu0 %1828 }
 0x2d1   : > { %1957 = vrot.lane.b32.xlu1 %v967_v22, %s2683_s27  ;;  %v3376_v22 = vpop.permute.xlu1 %1663  ;;  %3869 = vst [vmem:[#allocation16_spill] sm:$0xff] %v3398_v18 }
 0x2d2   : > { %3867 = vst [vmem:[#allocation14_spill] sm:$0xff] %v3376_v22 }
 0x2d3   : > { %1381 = vrot.lane.b32.xlu0 %v971_v32, %s2682_s24  ;;  %v985_v32 = vpop.f32.mrf.mxu0 }
 0x2d5   : > { %1748 = vrot.lane.b32.xlu1 %v1704_v19, %s2677_s28  ;;  %v3385_v19 = vmul.f32 %v3016_v45, %v977_v49  ;;  %v3391_v36 = vpop.permute.xlu1 %1658 }
 0x2d6   : > { %3868 = vst [vmem:[#allocation15_spill] sm:$0xff] %v3391_v36 }
 0x2d7   : > { %1188 = vrot.lane.b32.xlu0 %v3368_v30, %s2683_s27 }
 0x2d9   : > { %1959 = vrot.lane.b32.xlu1 %v973_v29, %s2683_s27  ;;  %v1707_v29 = vmul.f32 %v3381_v16, %v985_v32  ;;  %v3400_v45 = vpop.permute.xlu1 %1648 }
 0x2da   : > { %3870 = vst [vmem:[#allocation17_spill] sm:$0xff] %v3400_v45 }
 0x2db   : > { %1383 = vrot.lane.b32.xlu0 %v977_v49, %s2682_s24  ;;  %v1706_v49 = vmul.f32 %v3385_v19, %v979_v11 }
 0x2dd   : > { %1750 = vrot.lane.b32.xlu1 %v1705_v3, %s2677_s28  ;;  %v3403_v3 = vpop.permute.xlu0 %1668  ;;  %v3406_v22 = vpop.permute.xlu1 %1643 }
 0x2de   : > { %3871 = vst [vmem:[#allocation18_spill] sm:$0xff] %v3403_v3  ;;  %3872 = vst [vmem:[#allocation19_spill] sm:$0xff] %v3406_v22 }
 0x2df   : > { %1192 = vrot.lane.b32.xlu0 %v3381_v16, %s2683_s27 }
 0x2e1   : > { %1190 = vrot.lane.b32.xlu1 %v3385_v19, %s2683_s27  ;;  %v3409_v36 = vpop.permute.xlu0 %1653 }
 0x2e2   : > { %3873 = vst [vmem:[#allocation20_spill] sm:$0xff] %v3409_v36 }
 0x2e3   : > { %1754 = vrot.lane.b32.xlu0 %v1707_v29, %s2677_s28  ;;  %v3412_v29 = vpop.permute.xlu1 %1638 }
 0x2e4   : > { %3874 = vst [vmem:[#allocation21_spill] sm:$0xff] %v3412_v29 }
 0x2e5   : > { %1961 = vrot.lane.b32.xlu1 %v979_v11, %s2683_s27 }
 0x2e9   : > { %1385 = vrot.lane.b32.xlu1 %v983_v25, %s2682_s24 }
 0x2ed   : > { %1752 = vrot.lane.b32.xlu1 %v1706_v49, %s2677_s28 }
 0x2f1   : > { %1963 = vrot.lane.b32.xlu1 %v985_v32, %s2683_s27 }
 0x2f5   : > { %v1356_v15 = vpop.permute.xlu0 %1355 }
 0x2f6   : > { %v1403_v18 = vmul.f32 %v1356_v15, %v3170_v21 }
 0x2f7   : > { %v1163_v45 = vpop.permute.xlu1 %1162 }
 0x2f8   : > { %1211 = vst.msk [vmem:[#allocation4] sm:$0xff] %vm446_vm0, %v1163_v45  ;;  %1435 = vrot.lane.b32.xlu0 %v1403_v18, %s2677_s28 }
 0x2f9   : > { %v1934_v25 = vpop.permute.xlu0 %1933 }
 0x2fa   : > { %v1981_v11 = vmul.f32 %v1934_v25, %v3170_v21 }
 0x2fb   : > { %v1936_v3 = vpop.permute.xlu1 %1935 }
 0x2fc   : > { %v1982_v49 = vmul.f32 %v1936_v3, %v3196_v48  ;;  %2013 = vrot.lane.b32.xlu0 %v1981_v11, %s2677_s28 }
 0x2fd   : > { %v1358_v36 = vpop.permute.xlu0 %1357 }
 0x2fe   : > { %v1404_v32 = vmul.f32 %v1358_v36, %v3196_v48  ;;  %2015 = vrot.lane.b32.xlu1 %v1982_v49, %s2677_s28 }
 0x2ff   : > { %v1167_v22 = vpop.permute.xlu1 %1166 }
 0x300   : > { %1213 = vst.msk [vmem:[#allocation4 + $0x10] sm:$0xff] %vm446_vm0, %v1167_v22  ;;  %1437 = vrot.lane.b32.xlu0 %v1404_v32, %s2677_s28 }
 0x301   : > { %v1165_v15 = vpop.permute.xlu0 %1164 }
 0x302   : > { %1212 = vst.msk [vmem:[#allocation4 + $0x8] sm:$0xff] %vm446_vm0, %v1165_v15 }
 0x303   : > { %v1938_v18 = vpop.permute.xlu1 %1937 }
 0x304   : > { %v1983_v45 = vmul.f32 %v1938_v18, %v3191_v47 }
 0x305   : > { %v1360_v25 = vpop.permute.xlu0 %1359 }
 0x306   : > { %v1405_v3 = vmul.f32 %v1360_v25, %v3191_v47  ;;  %2017 = vrot.lane.b32.xlu1 %v1983_v45, %s2677_s28 }
 0x307   : > { %v1940_v11 = vpop.permute.xlu1 %1939 }
 0x308   : > { %1439 = vrot.lane.b32.xlu0 %v1405_v3, %s2677_s28  ;;  %v1984_v15 = vmul.f32 %v1940_v11, %v3228_v39 }
 0x309   : > { %v1362_v36 = vpop.permute.xlu0 %1361 }
 0x30a   : > { %v1406_v49 = vmul.f32 %v1362_v36, %v3228_v39 }
 0x30b   : > { %v1171_v22 = vpop.permute.xlu1 %1170 }
 0x30c   : > { %1215 = vst.msk [vmem:[#allocation4 + $0x20] sm:$0xff] %vm446_vm0, %v1171_v22  ;;  %1441 = vrot.lane.b32.xlu1 %v1406_v49, %s2677_s28 }
 0x30d   : > { %v1169_v32 = vpop.permute.xlu0 %1168 }
 0x30e   : > { %1214 = vst.msk [vmem:[#allocation4 + $0x18] sm:$0xff] %vm446_vm0, %v1169_v32 }
 0x30f   : > { %v1942_v18 = vpop.permute.xlu1 %1941 }
 0x310   : > { %v1985_v25 = vmul.f32 %v1942_v18, %v3221_v37  ;;  %2019 = vrot.lane.b32.xlu1 %v1984_v15, %s2677_s28 }
 0x311   : > { %v1364_v45 = vpop.permute.xlu0 %1363 }
 0x312   : > { %v1407_v3 = vmul.f32 %v1364_v45, %v3221_v37  ;;  %2021 = vrot.lane.b32.xlu0 %v1985_v25, %s2677_s28 }
 0x313   : > { %v1944_v36 = vpop.permute.xlu1 %1943 }
 0x314   : > { %v1986_v22 = vmul.f32 %v1944_v36, %v3260_v59  ;;  %1443 = vrot.lane.b32.xlu1 %v1407_v3, %s2677_s28 }
 0x315   : > { %v1366_v49 = vpop.permute.xlu0 %1365 }
 0x316   : > { %v1408_v11 = vmul.f32 %v1366_v49, %v3260_v59  ;;  %2023 = vrot.lane.b32.xlu0 %v1986_v22, %s2677_s28 }
 0x317   : > { %v1175_v32 = vpop.permute.xlu1 %1174 }
 0x318   : > { %1217 = vst.msk [vmem:[#allocation4 + $0x30] sm:$0xff] %vm446_vm0, %v1175_v32  ;;  %1445 = vrot.lane.b32.xlu1 %v1408_v11, %s2677_s28 }
 0x319   : > { %v1173_v15 = vpop.permute.xlu0 %1172 }
 0x31a   : > { %1216 = vst.msk [vmem:[#allocation4 + $0x28] sm:$0xff] %vm446_vm0, %v1173_v15 }
 0x31b   : > { %v1946_v18 = vpop.permute.xlu1 %1945 }
 0x31c   : > { %v1987_v25 = vmul.f32 %v1946_v18, %v3255_v58 }
 0x31d   : > { %v1368_v45 = vpop.permute.xlu0 %1367 }
 0x31e   : > { %v1409_v36 = vmul.f32 %v1368_v45, %v3255_v58  ;;  %2025 = vrot.lane.b32.xlu0 %v1987_v25, %s2677_s28 }
 0x31f   : > { %v1948_v3 = vpop.permute.xlu1 %1947 }
 0x320   : > { %v1988_v49 = vmul.f32 %v1948_v3, %v3292_v51  ;;  %1447 = vrot.lane.b32.xlu1 %v1409_v36, %s2677_s28 }
 0x321   : > { %v1370_v22 = vpop.permute.xlu0 %1369 }
 0x322   : > { %v1410_v32 = vmul.f32 %v1370_v22, %v3292_v51  ;;  %2027 = vrot.lane.b32.xlu0 %v1988_v49, %s2677_s28 }
 0x323   : > { %v1179_v11 = vpop.permute.xlu1 %1178 }
 0x324   : > { %1219 = vst.msk [vmem:[#allocation4 + $0x40] sm:$0xff] %vm446_vm0, %v1179_v11  ;;  %1449 = vrot.lane.b32.xlu1 %v1410_v32, %s2677_s28 }
 0x325   : > { %v1177_v15 = vpop.permute.xlu0 %1176 }
 0x326   : > { %1218 = vst.msk [vmem:[#allocation4 + $0x38] sm:$0xff] %vm446_vm0, %v1177_v15 }
 0x327   : > { %v1950_v18 = vpop.permute.xlu1 %1949 }
 0x328   : > { %v1989_v25 = vmul.f32 %v1950_v18, %v3287_v46 }
 0x329   : > { %v1372_v45 = vpop.permute.xlu0 %1371 }
 0x32a   : > { %v1411_v3 = vmul.f32 %v1372_v45, %v3287_v46  ;;  %2029 = vrot.lane.b32.xlu0 %v1989_v25, %s2677_s28 }
 0x32b   : > { %v1952_v36 = vpop.permute.xlu1 %1951 }
 0x32c   : > { %v1990_v22 = vmul.f32 %v1952_v36, %v3322_v17  ;;  %1451 = vrot.lane.b32.xlu1 %v1411_v3, %s2677_s28 }
 0x32d   : > { %v1374_v49 = vpop.permute.xlu0 %1373 }
 0x32e   : > { %v1412_v11 = vmul.f32 %v1374_v49, %v3322_v17  ;;  %2031 = vrot.lane.b32.xlu0 %v1990_v22, %s2677_s28 }
 0x32f   : > { %v1183_v32 = vpop.permute.xlu1 %1182 }
 0x330   : > { %1221 = vst.msk [vmem:[#allocation4 + $0x50] sm:$0xff] %vm446_vm0, %v1183_v32  ;;  %1453 = vrot.lane.b32.xlu1 %v1412_v11, %s2677_s28 }
 0x331   : > { %v1181_v15 = vpop.permute.xlu0 %1180 }
 0x332   : > { %1220 = vst.msk [vmem:[#allocation4 + $0x48] sm:$0xff] %vm446_vm0, %v1181_v15 }
 0x333   : > { %v1954_v18 = vpop.permute.xlu1 %1953 }
 0x334   : > { %v1991_v25 = vmul.f32 %v1954_v18, %v3317_v50 }
 0x335   : > { %v1376_v45 = vpop.permute.xlu0 %1375 }
 0x336   : > { %v1413_v36 = vmul.f32 %v1376_v45, %v3317_v50  ;;  %2033 = vrot.lane.b32.xlu0 %v1991_v25, %s2677_s28 }
 0x337   : > { %v1956_v3 = vpop.permute.xlu1 %1955 }
 0x338   : > { %v1992_v49 = vmul.f32 %v1956_v3, %v3335_v2  ;;  %1455 = vrot.lane.b32.xlu1 %v1413_v36, %s2677_s28 }
 0x339   : > { %v1378_v22 = vpop.permute.xlu0 %1377 }
 0x33a   : > { %v1414_v32 = vmul.f32 %v1378_v22, %v3335_v2  ;;  %2035 = vrot.lane.b32.xlu0 %v1992_v49, %s2677_s28 }
 0x33b   : > { %v3472_v11 = vpop.permute.xlu1 %1746 }
 0x33c   : > { %3875 = vst [vmem:[#allocation22_spill] sm:$0xff] %v3472_v11  ;;  %1457 = vrot.lane.b32.xlu1 %v1414_v32, %s2677_s28 }
 0x33d   : > { %v1185_v15 = vpop.permute.xlu0 %1184 }
 0x33e   : > { %1222 = vst.msk [vmem:[#allocation4 + $0x58] sm:$0xff] %vm446_vm0, %v1185_v15 }
 0x33f   : > { %v1187_v18 = vpop.permute.xlu1 %1186 }
 0x340   : > { %1223 = vst.msk [vmem:[#allocation4 + $0x60] sm:$0xff] %vm446_vm0, %v1187_v18 }
 0x341   : > { %v1380_v25 = vpop.permute.xlu0 %1379 }
 0x342   : > { %v1415_v45 = vmul.f32 %v1380_v25, %v3349_v52 }
 0x343   : > { %v1958_v3 = vpop.permute.xlu1 %1957 }
 0x344   : > { %v1993_v36 = vmul.f32 %v1958_v3, %v3349_v52  ;;  %1459 = vrot.lane.b32.xlu1 %v1415_v45, %s2677_s28 }
 0x345   : > { %v1382_v49 = vpop.permute.xlu0 %1381 }
 0x346   : > { %v1416_v22 = vmul.f32 %v1382_v49, %v3368_v30  ;;  %2037 = vrot.lane.b32.xlu0 %v1993_v36, %s2677_s28  ;;  %v1587_v49 = vld [vmem:[%s2863_s22 + $0x38] sm:$0xff] }
 0x347   : > { %v3482_v32 = vpop.permute.xlu1 %1748 }
 0x348   : > { %3876 = vst [vmem:[#allocation23_spill] sm:$0xff] %v3482_v32  ;;  %1461 = vrot.lane.b32.xlu1 %v1416_v22, %s2677_s28 }
 0x349   : > { %v1189_v15 = vpop.permute.xlu0 %1188 }
 0x34a   : > { %1224 = vst.msk [vmem:[#allocation4 + $0x68] sm:$0xff] %vm446_vm0, %v1189_v15  ;;  %v1702_v15 = vmul.f32 %v3317_v50, %v3304_v35 }
 0x34b   : > { %v1960_v18 = vpop.permute.xlu1 %1959 }
 0x34c   : > { %v1994_v25 = vmul.f32 %v1960_v18, %v3368_v30 }
 0x34d   : > { %v1384_v3 = vpop.permute.xlu0 %1383 }
 0x34e   : > { %v1417_v45 = vmul.f32 %v1384_v3, %v3385_v19  ;;  %2039 = vrot.lane.b32.xlu0 %v1994_v25, %s2677_s28  ;;  %v1586_v25 = vld [vmem:[%s2863_s22 + $0x30] sm:$0xff] }
 0x34f   : > { %v3489_v11 = vpop.permute.xlu1 %1750 }
 0x350   : > { %3877 = vst [vmem:[#allocation24_spill] sm:$0xff] %v3489_v11  ;;  %1463 = vrot.lane.b32.xlu1 %v1417_v45, %s2677_s28 }
 0x351   : > { %v1193_v36 = vpop.permute.xlu0 %1192 }
 0x352   : > { %1226 = vst.msk [vmem:[#allocation4 + $0x78] sm:$0xff] %vm446_vm0, %v1193_v36 }
 0x353   : > { %v1191_v22 = vpop.permute.xlu1 %1190 }
 0x354   : > { %1225 = vst.msk [vmem:[#allocation4 + $0x70] sm:$0xff] %vm446_vm0, %v1191_v22  ;;  %1633 = vperm.xlu1 %2591, %v1587_v49   ;;  %v1701_v49 = vmul.f32 %v3322_v17, %v3284_v44  ;;  %v1585_v22 = vld [vmem:[%s2863_s22 + $0x28] sm:$0xff]  ;;  %v1584_v44 = vld [vmem:[%s2863_s22 + $0x20] sm:$0xff] }
 0x357   : > { %v1962_v18 = vpop.permute.xlu1 %1961 }
 0x358   : > { %v1995_v3 = vmul.f32 %v1962_v18, %v3385_v19  ;;  %1744 = vrot.lane.b32.xlu1 %v1702_v15, %s2677_s28 }
 0x35a   : > { %2041 = vrot.lane.b32.xlu0 %v1995_v3, %s2677_s28  ;;  %v1700_v3 = vmul.f32 %v3287_v46, %v3264_v60 }
 0x35b   : > { %v1386_v45 = vpop.permute.xlu1 %1385 }
 0x35c   : > { %v1418_v36 = vmul.f32 %v1386_v45, %v3381_v16  ;;  %1628 = vperm.xlu1 %2591, %v1586_v25   ;;  %v1699_v25 = vmul.f32 %v3292_v51, %v3247_v54  ;;  %v1583_v45 = vld [vmem:[%s2863_s22 + $0x18] sm:$0xff] }
 0x35e   : > { %1465 = vrot.lane.b32.xlu0 %v1418_v36, %s2677_s28  ;;  %v3519_v36 = vpop.permute.xlu0 %1754 }
 0x35f   : > { %v3505_v35 = vpop.permute.xlu1 %1752  ;;  %3879 = vst [vmem:[#allocation26_spill] sm:$0xff] %v3519_v36 }
 0x360   : > { %3878 = vst [vmem:[#allocation25_spill] sm:$0xff] %v3505_v35  ;;  %1742 = vrot.lane.b32.xlu1 %v1701_v49, %s2677_s28  ;;  %v1698_v49 = vmul.f32 %v3255_v58, %v3236_v42  ;;  %v1581_v42 = vld [vmem:[%s2863_s22 + $0x8] sm:$0xff]  ;;  %v1696_v35 = vmul.f32 %v3221_v37, %v3213_v33  ;;  %v1329_v33 = vmul.f32 %v3266_v0, %v3255_v58 }
 0x361   : > { %v1908_v0 = vmul.f32 %v3332_v57, %v3292_v51  ;;  %v1332_v57 = vmul.f32 %v3215_v34, %v3322_v17  ;;  %v1911_v34 = vmul.f32 %v3290_v14, %v3317_v50  ;;  %v1335_v14 = vmul.f32 %v3165_v1, %v3349_v52 }
 0x363   : > { %v1964_v15 = vpop.permute.xlu1 %1963 }
 0x364   : > { %v1996_v18 = vmul.f32 %v1964_v15, %v3381_v16  ;;  %1623 = vperm.xlu1 %2591, %v1585_v22   ;;  %v1582_v15 = vld [vmem:[%s2863_s22 + $0x10] sm:$0xff] }
 0x366   : > { %2043 = vrot.lane.b32.xlu0 %v1996_v18, %s2677_s28 }
 0x368   : > { %1740 = vrot.lane.b32.xlu1 %v1700_v3, %s2677_s28  ;;  %v1697_v3 = vmul.f32 %v3260_v59, %v3224_v38 }
 0x36a   : > { %v3523_v60 = vpop.permute.xlu0 %1435 }
 0x36c   : > { %1618 = vperm.xlu1 %2591, %v1584_v44  }
 0x36e   : > { %v3531_v54 = vpop.permute.xlu0 %2013 }
 0x370   : > { %1738 = vrot.lane.b32.xlu1 %v1699_v25, %s2677_s28  ;;  %v3525_v22 = vpop.permute.xlu1 %2015 }
 0x372   : > { %v3539_v25 = vpop.permute.xlu0 %1437 }
 0x374   : > { %1613 = vperm.xlu1 %2591, %v1583_v45  }
 0x378   : > { %1736 = vrot.lane.b32.xlu1 %v1698_v49, %s2677_s28  ;;  %v3529_v18 = vpop.permute.xlu1 %2017  ;;  %v1327_v49 = vmul.f32 %v3296_v31, %v3221_v37 }
 0x37c   : > { %1608 = vperm.xlu1 %2591, %v1582_v15   ;;  %v3547_v15 = vpop.permute.xlu0 %1439 }
 0x37e   : > { %v3535_v44 = vpop.permute.xlu1 %1441 }
 0x380   : > { %1734 = vrot.lane.b32.xlu1 %v1697_v3, %s2677_s28  ;;  %v1328_v3 = vmul.f32 %v3279_v23, %v3260_v59 }
 0x382   : > { %v3541_v45 = vpop.permute.xlu1 %2019 }
 0x384   : > { %1603 = vperm.xlu1 %2591, %v1581_v42   ;;  %v3553_v11 = vpop.permute.xlu0 %2021 }
 0x386   : > { %v1444_v36 = vpop.permute.xlu1 %1443 }
 0x387   : > { %v1487_v38 = vadd.f32 %v1444_v36, %v1327_v49 }
 0x388   : > { %1732 = vrot.lane.b32.xlu1 %v1696_v35, %s2677_s28  ;;  %v3556_v31 = vpop.permute.xlu0 %2023  ;;  %v1907_v35 = vmul.f32 %v3343_v13, %v3255_v58  ;;  %v1331_v13 = vmul.f32 %v3232_v41, %v3287_v46  ;;  %v1910_v41 = vmul.f32 %v3308_v8, %v3322_v17  ;;  %v1334_v8 = vmul.f32 %v3185_v26, %v3335_v2 }
 0x389   : > { %1523 = vrot.lane.b32.xlu0 %v1487_v38, %s2683_s27  ;;  %v1913_v26 = vmul.f32 %v3258_v12, %v3349_v52 }
 0x38a   : > { %v1446_v42 = vpop.permute.xlu1 %1445 }
 0x38b   : > { %v1488_v32 = vadd.f32 %v1446_v42, %v1328_v3  ;;  %v1330_v3 = vmul.f32 %v3249_v55, %v3292_v51  ;;  %v1909_v55 = vmul.f32 %v3320_v56, %v3287_v46  ;;  %v1333_v56 = vmul.f32 %v3200_v20, %v3317_v50 }
 0x38c   : > { %v1912_v20 = vmul.f32 %v3276_v4, %v3335_v2  ;;  %v1336_v4 = vmul.f32 %v3161_v63, %v3368_v30  ;;  %v1337_v63 = vmul.f32 %v3226_v9, %v3385_v19  ;;  %v1695_v9 = vmul.f32 %v3228_v39, %v3204_v27 }
 0x38d   : > { %1525 = vrot.lane.b32.xlu0 %v1488_v32, %s2683_s27 }
 0x390   : > { %v2026_v49 = vpop.permute.xlu0 %2025 }
 0x391   : > { %v2067_v23 = vadd.f32 %v2026_v49, %v1907_v35 }
 0x392   : > { %v1448_v29 = vpop.permute.xlu1 %1447 }
 0x393   : > { %v1489_v36 = vadd.f32 %v1448_v29, %v1329_v33 }
 0x394   : > { %v2028_v42 = vpop.permute.xlu0 %2027 }
 0x395   : > { %1527 = vrot.lane.b32.xlu0 %v1489_v36, %s2683_s27  ;;  %v2068_v29 = vadd.f32 %v2028_v42, %v1908_v0 }
 0x396   : > { %v1450_v38 = vpop.permute.xlu1 %1449 }
 0x397   : > { %v1490_v32 = vadd.f32 %v1450_v38, %v1330_v3 }
 0x399   : > { %2105 = vrot.lane.b32.xlu0 %v2067_v23, %s2682_s24 }
 0x39c   : > { %v2030_v49 = vpop.permute.xlu0 %2029 }
 0x39d   : > { %1529 = vrot.lane.b32.xlu0 %v1490_v32, %s2683_s27  ;;  %v2069_v35 = vadd.f32 %v2030_v49, %v1909_v55 }
 0x39e   : > { %v1452_v33 = vpop.permute.xlu1 %1451 }
 0x39f   : > { %v1491_v36 = vadd.f32 %v1452_v33, %v1331_v13 }
 0x3a0   : > { %v2032_v3 = vpop.permute.xlu0 %2031 }
 0x3a1   : > { %2107 = vrot.lane.b32.xlu0 %v2068_v29, %s2682_s24  ;;  %v2070_v32 = vadd.f32 %v2032_v3, %v1910_v41 }
 0x3a2   : > { %v1454_v23 = vpop.permute.xlu1 %1453 }
 0x3a3   : > { %v1492_v38 = vadd.f32 %v1454_v23, %v1332_v57 }
 0x3a5   : > { %1531 = vrot.lane.b32.xlu0 %v1491_v36, %s2683_s27 }
 0x3a8   : > { %v2034_v29 = vpop.permute.xlu0 %2033 }
 0x3a9   : > { %2109 = vrot.lane.b32.xlu0 %v2069_v35, %s2682_s24  ;;  %v2071_v33 = vadd.f32 %v2034_v29, %v1911_v34  ;;  %v1338_v29 = vmul.f32 %v3157_v61, %v3381_v16 }
 0x3aa   : > { %v1456_v42 = vpop.permute.xlu1 %1455 }
 0x3ab   : > { %v1493_v0 = vadd.f32 %v1456_v42, %v1333_v56  ;;  %v1914_v56 = vmul.f32 %v3168_v5, %v3368_v30  ;;  %v1580_v5 = vld [vmem:[%s2863_s22] sm:$0xff]  ;;  %s426_s22 = scalar_select %p425_p12, %s2666_s16, 1 }
 0x3ac   : > { %v2036_v49 = vpop.permute.xlu0 %2035 }
 0x3ad   : > { %1533 = vrot.lane.b32.xlu0 %v1492_v38, %s2683_s27  ;;  %v2072_v55 = vadd.f32 %v2036_v49, %v1912_v20  ;;  %s427_s11 = scalar_lea.vmem %s3847_s3, %s426_s22 }
 0x3ae   : > { %v1458_v13 = vpop.permute.xlu1 %1457 }
 0x3af   : > { %v1494_v36 = vadd.f32 %v1458_v13, %v1334_v8 }
 0x3b1   : > { %2111 = vrot.lane.b32.xlu0 %v2070_v32, %s2682_s24 }
 0x3b5   : > { %1535 = vrot.lane.b32.xlu0 %v1493_v0, %s2683_s27 }
 0x3b6   : > { %v1460_v35 = vpop.permute.xlu1 %1459 }
 0x3b7   : > { %v1495_v23 = vadd.f32 %v1460_v35, %v1335_v14  ;;  %v1905_v35 = vmul.f32 %v3363_v28, %v3221_v37 }
 0x3b8   : > { %v2038_v57 = vpop.permute.xlu0 %2037 }
 0x3b9   : > { %2113 = vrot.lane.b32.xlu0 %v2071_v33, %s2682_s24  ;;  %v2073_v38 = vadd.f32 %v2038_v57, %v1913_v26  ;;  %v1906_v57 = vmul.f32 %v3355_v43, %v3260_v59 }
 0x3ba   : > { %v1462_v3 = vpop.permute.xlu1 %1461 }
 0x3bb   : > { %v1496_v32 = vadd.f32 %v1462_v3, %v1336_v4  ;;  %v2066_v27 = vadd.f32 %v3556_v31, %v1906_v57  ;;  %v1694_v31 = vmul.f32 %v3191_v47, %v3194_v7  ;;  %v3880_v3 = vld [vmem:[#allocation13_spill] sm:$0xff] }
 0x3bd   : > { %1537 = vrot.lane.b32.xlu0 %v1494_v36, %s2683_s27  ;;  %v1915_v36 = vmul.f32 %v3244_v53, %v3385_v19 }
 0x3c0   : > { %v2040_v41 = vpop.permute.xlu0 %2039 }
 0x3c1   : > { %2115 = vrot.lane.b32.xlu0 %v2072_v55, %s2682_s24  ;;  %v2074_v12 = vadd.f32 %v2040_v41, %v1914_v56  ;;  %v1916_v55 = vmul.f32 %v3159_v62, %v3381_v16  ;;  %v1325_v62 = vmul.f32 %v3326_v10, %v3191_v47  ;;  %v1693_v10 = vmul.f32 %v3196_v48, %v3183_v24  ;;  %v3881_v24 = vld [vmem:[#allocation10_spill] sm:$0xff] }
 0x3c2   : > { %v1464_v1 = vpop.permute.xlu1 %1463  ;;  %v1904_v41 = vmul.f32 %v3880_v3, %v3228_v39  ;;  %v1323_v4 = vmul.f32 %v3881_v24, %v3170_v21 }
 0x3c3   : > { %v1497_v13 = vadd.f32 %v1464_v1, %v1337_v63  ;;  %v1485_v26 = vadd.f32 %v3547_v15, %v1325_v62  ;;  %v1903_v15 = vmul.f32 %v3389_v6, %v3191_v47  ;;  %v3882_v1 = vld [vmem:[#allocation9_spill] sm:$0xff] }
 0x3c4   : > { %v1483_v6 = vadd.f32 %v3523_v60, %v1323_v4  ;;  %v3884_v60 = vld [vmem:[#allocation8_spill] sm:$0xff] }
 0x3c5   : > { %1539 = vrot.lane.b32.xlu0 %v1495_v23, %s2683_s27  ;;  %v2065_v23 = vadd.f32 %v3553_v11, %v1905_v35 }
 0x3c9   : > { %2117 = vrot.lane.b32.xlu0 %v2073_v38, %s2682_s24  ;;  %v1326_v38 = vmul.f32 %v3311_v40, %v3228_v39 }
 0x3cb   : > { %v1486_v11 = vadd.f32 %v3535_v44, %v1326_v38  ;;  %v2063_v44 = vadd.f32 %v3529_v18, %v1903_v15  ;;  %v1324_v18 = vmul.f32 %v3882_v1, %v3196_v48  ;;  %v3891_v1 = vld [vmem:[#allocation22_spill] sm:$0xff] }
 0x3cc   : > { %v2042_v42 = vpop.permute.xlu0 %2041 }
 0x3cd   : > { %1541 = vrot.lane.b32.xlu0 %v1496_v32, %s2683_s27  ;;  %v2075_v49 = vadd.f32 %v2042_v42, %v1915_v36  ;;  %v2064_v32 = vadd.f32 %v3541_v45, %v1904_v41  ;;  %v3883_v42 = vld [vmem:[#allocation11_spill] sm:$0xff] }
 0x3ce   : > { %v1901_v56 = vmul.f32 %v3883_v42, %v3170_v21 }
 0x3cf   : > { %v3605_v0 = vpop.permute.xlu1 %1633 }
 0x3d0   : > { %v1466_v34 = vpop.permute.xlu0 %1465  ;;  %v2061_v45 = vadd.f32 %v3531_v54, %v1901_v56  ;;  %v3687_v54 = vld [vmem:[%s427_s11] ss:$0 sm:$0xff] }
 0x3d1   : > { %v1498_v33 = vadd.f32 %v1466_v34, %v1338_v29  ;;  %2119 = vrot.lane.b32.xlu0 %v2074_v12, %s2682_s24  ;;  %v1484_v12 = vadd.f32 %v3539_v25, %v1324_v18  ;;  %v1692_v34 = vmul.f32 %v3170_v21, %v3884_v60  ;;  %v3886_v25 = vld [vmem:[#allocation16_spill] sm:$0xff] }
 0x3d3   : > { %1545 = vrot.lane.b32.xlu1 %v1498_v33, %s2683_s27  ;;  %v3613_v8 = vpop.permute.xlu1 %1744  ;;  %v3885_v33 = vlaneseq }
 0x3d5   : > { %1543 = vrot.lane.b32.xlu0 %v1497_v13, %s2683_s27  ;;  %v762_v13 = vshrl.u32 %v3885_v33, 7  ;;  %v3895_v33 = vld [vmem:[#allocation24_spill] sm:$0xff] }
 0x3d7   : > { %1598 = vperm.xlu1 %2591, %v1580_v5   ;;  %v3619_v61 = vpop.permute.xlu1 %1628  ;;  %v1902_v5 = vmul.f32 %v3886_v25, %v3196_v48  ;;  %v3689_v36 = vadd.s32 8, %v762_v13  ;;  %vm768_vm0 = vcmp.eq.s32.totalorder %v762_v13, %v3687_v54 }
 0x3d8   : > { %v2044_v20 = vpop.permute.xlu0 %2043  ;;  %v1682_v38 = vmul.f32 %v3619_v61, %v3255_v58  ;;  %v3887_v61 = vld [vmem:[#allocation21_spill] sm:$0xff] }
 0x3d9   : > { %2121 = vrot.lane.b32.xlu0 %v2075_v49, %s2682_s24  ;;  %v2076_v14 = vadd.f32 %v2044_v20, %v1916_v55  ;;  %v2062_v49 = vadd.f32 %v3525_v22, %v1902_v5  ;;  %vm769_vm6 = vcmp.eq.s32.totalorder %v3689_v36, %v3687_v54  ;;  %v1684_v15 = vmul.f32 %v3887_v61, %v3287_v46 }
 0x3db   : > { %1730 = vrot.lane.b32.xlu1 %v1695_v9, %s2677_s28  ;;  %v3629_v53 = vpop.permute.xlu1 %1742  ;;  %v2684_v9 = vmov 1.0  }
 0x3dc   : > { %2512 = vmatprep.mubr.msk.f32.mxu1 %vm768_vm0, %v2684_v9 }
 0x3dd   : > { %2123 = vrot.lane.b32.xlu0 %v2076_v14, %s2682_s24 }
 0x3df   : > { %2101 = vrot.lane.b32.xlu1 %v2065_v23, %s2682_s24  ;;  %v1624_v28 = vpop.permute.xlu1 %1623 }
 0x3e0   : > { %v1681_v14 = vmul.f32 %v1624_v28, %v3260_v59 }
 0x3e1   : > { %2103 = vrot.lane.b32.xlu0 %v2066_v27, %s2682_s24 }
 0x3e3   : > { %1519 = vrot.lane.b32.xlu1 %v1485_v26, %s2683_s27  ;;  %v3645_v43 = vpop.permute.xlu1 %1740 }
 0x3e5   : > { %1521 = vrot.lane.b32.xlu0 %v1486_v11, %s2683_s27 }
 0x3e7   : > { %1726 = vrot.lane.b32.xlu1 %v1693_v10, %s2677_s28  ;;  %v1619_v40 = vpop.permute.xlu1 %1618  ;;  %v1683_v10 = vmul.f32 %v3605_v0, %v3292_v51  ;;  %v3888_v0 = vld [vmem:[#allocation19_spill] sm:$0xff] }
 0x3e8   : > { %v1680_v62 = vmul.f32 %v1619_v40, %v3221_v37  ;;  %v1780_v40 = vadd.f32 %v3645_v43, %v1684_v15  ;;  %v1685_v3 = vmul.f32 %v3888_v0, %v3322_v17  ;;  %v3889_v43 = vld [vmem:[#allocation17_spill] sm:$0xff] }
 0x3e9   : > { %1728 = vrot.lane.b32.xlu0 %v1694_v31, %s2677_s28  ;;  %v1686_v4 = vmul.f32 %v3889_v43, %v3317_v50 }
 0x3ea   : > { %v1781_v41 = vadd.f32 %v3629_v53, %v1685_v3  ;;  %v3890_v53 = vld [vmem:[#allocation20_spill] sm:$0xff] }
 0x3eb   : > { %2097 = vrot.lane.b32.xlu1 %v2063_v44, %s2682_s24  ;;  %v1739_v7 = vpop.permute.xlu1 %1738 }
 0x3ec   : > { %v1779_v37 = vadd.f32 %v1739_v7, %v1683_v10 }
 0x3ed   : > { %2099 = vrot.lane.b32.xlu0 %v2064_v32, %s2682_s24  ;;  %v1782_v32 = vadd.f32 %v3613_v8, %v1686_v4  ;;  %v3892_v8 = vld [vmem:[#allocation15_spill] sm:$0xff] }
 0x3ee   : > { %v1688_v56 = vmul.f32 %v3892_v8, %v3349_v52  ;;  %v3896_v52 = vld [vmem:[#allocation12_spill] sm:$0xff] }
 0x3ef   : > { %1515 = vrot.lane.b32.xlu1 %v1483_v6, %s2683_s27  ;;  %v3671_v29 = vpop.permute.xlu1 %1613  ;;  %v1687_v6 = vmul.f32 %v3890_v53, %v3335_v2  ;;  %v1691_v5 = vmul.f32 %v3896_v52, %v3381_v16 }
 0x3f1   : > { %1517 = vrot.lane.b32.xlu0 %v1484_v12, %s2683_s27  ;;  %v1783_v18 = vadd.f32 %v3891_v1, %v1687_v6  ;;  %v3893_v12 = vld [vmem:[#allocation23_spill] sm:$0xff] }
 0x3f3   : > { %2093 = vrot.lane.b32.xlu1 %v2061_v45, %s2682_s24  ;;  %v1737_v63 = vpop.permute.xlu1 %1736  ;;  %v1784_v45 = vadd.f32 %v3893_v12, %v1688_v56 }
 0x3f4   : > { %v1778_v11 = vadd.f32 %v1737_v63, %v1682_v38 }
 0x3f5   : > { %1724 = vrot.lane.b32.xlu0 %v1692_v34, %s2677_s28  ;;  %v3894_v34 = vld [vmem:[#allocation14_spill] sm:$0xff]  ;;  %s405_s28 = sand.u32 1, %s2658_s14  }
 0x3f6   : > { %v1689_v63 = vmul.f32 %v3894_v34, %v3368_v30  ;;  %v3899_v30 = vld [vmem:[#allocation25_spill] sm:$0xff]  ;;  %s2372_s12 = sshll.u32 %s405_s28, 4  ;;  %s3799_s30 = scalar_lea.sflag [#allocation6], %s405_s28 }
 0x3f7   : > { %v3692_v20 = vpop.permute.xlu1 %1608  ;;  %s407_s19 = scalar_lea.vmem [#allocation5], %s2372_s12 }
 0x3f8   : > { %v1785_v13 = vadd.f32 %v3895_v33, %v1689_v63  ;;  %s2276_s20 = sshll.u32 %s407_s19, 4  ;;  %s3792_s20 = int_to_ptr.vmem [resolvable:$true] %s2276_s20 }
 0x3f9   : > { %2095 = vrot.lane.b32.xlu0 %v2062_v49, %s2682_s24  ;;  %s2427_s24 = sshll.u32 %s2666_s16, 8  ;;  %s2598_s11 = scalar_lea.vmem %s3792_s20, 256 }
 0x3fa   : > { %s3797_s29 = scalar_lea.hbm %s3854_s10, %s2427_s24  ;;  %p2599_p13 = scmp.ne.s32.totalorder %s3792_s20, %s2598_s11 }
 0x3fb   : > { %v1524_v55 = vpop.permute.xlu0 %1523  ;;  %v1735_v35 = vpop.permute.xlu1 %1734  ;;  %s2685_s16 = smov [#allocation5]  }
 0x3fc   : > { %1568 = vst.msk [vmem:[#allocation4 + $0x20] sm:$0xff] %vm1563_vm9, %v1524_v55  ;;  %v1777_v22 = vadd.f32 %v1735_v35, %v1681_v14  ;;  %v3897_v55 = vld [vmem:[#allocation26_spill] sm:$0xff]  ;;  %p2600_p0 = pnand %p2599_p13, %p2783_p4  ;;  %s2602_s12 = sshll.u32 %s2685_s16, 4  ;;  %s2603_s12 = int_to_ptr.vmem [resolvable:$false] %s2602_s12 }
 0x3fd   : > { %v1787_v35 = vadd.f32 %v3897_v55, %v1691_v5  ;;  %v3898_v14 = vld [vmem:[#allocation18_spill] sm:$0xff]  ;;  %s2604_s0 = scalar_lea.vmem %s2603_s12, 512  ;;  %p2605_p2 = scmp.lt.s32.totalorder %s3792_s20, %s2603_s12 }
 0x3fe   : > { %p2601_p1 = pneg %p2600_p0  ;;  %p2606_p3 = scmp.lt.s32.totalorder %s2604_s0, %s2598_s11 }
 0x3ff   : > { %v1526_v23 = vpop.permute.xlu0 %1525  ;;  %v3701_v57 = vpop.permute.xlu1 %1603 }
 0x400   : > { %1569 = vst.msk [vmem:[#allocation4 + $0x28] sm:$0xff] %vm1563_vm9, %v1526_v23  ;;  %v1677_v3 = vmul.f32 %v3701_v57, %v3196_v48  ;;  %p2607_p5 = por %p2606_p3, %p2605_p2 }
 0x401   : > { %1794 = vst.msk [vmem:[#allocation4 + $0x28] sm:$0xff] %vm1788_vm10, %v1777_v22  ;;  %v1690_v22 = vmul.f32 %v3898_v14, %v3385_v19 }
 0x402   : > { %p2608_p6 = pnand %p2607_p5, %p2601_p1 }
 0x403   : > { %v1733_v27 = vpop.permute.xlu1 %1732 }
 0x404   : > { %v1776_v26 = vadd.f32 %v1733_v27, %v1680_v62  ;;  %v1786_v62 = vadd.f32 %v3899_v30, %v1690_v22 }
 0x406   : > { %1793 = vst.msk [vmem:[#allocation4 + $0x20] sm:$0xff] %vm1788_vm10, %v1776_v26 }
 0x407   : > { %v1528_v59 = vpop.permute.xlu0 %1527 }
 0x408   : > { %1570 = vst.msk [vmem:[#allocation4 + $0x30] sm:$0xff] %vm1563_vm9, %v1528_v59 }
 0x409   : > { %1795 = vst.msk [vmem:[#allocation4 + $0x30] sm:$0xff] %vm1788_vm10, %v1778_v11  ;;  %v1679_v11 = vmul.f32 %v3671_v29, %v3228_v39  ;;  %v1678_v39 = vmul.f32 %v3692_v20, %v3191_v47 }
 0x40b   : > { %v2106_v28 = vpop.permute.xlu0 %2105 }
 0x40c   : > { %2148 = vst.msk [vmem:[#allocation4 + $0x30] sm:$0xff] %vm635_vm4, %v2106_v28 }
 0x40f   : > { %v1530_v31 = vpop.permute.xlu0 %1529 }
 0x410   : > { %1571 = vst.msk [vmem:[#allocation4 + $0x38] sm:$0xff] %vm1563_vm9, %v1530_v31 }
 0x411   : > { %1796 = vst.msk [vmem:[#allocation4 + $0x38] sm:$0xff] %vm1788_vm10, %v1779_v37 }
 0x413   : > { %v2108_v58 = vpop.permute.xlu0 %2107 }
 0x414   : > { %2149 = vst.msk [vmem:[#allocation4 + $0x38] sm:$0xff] %vm635_vm4, %v2108_v58 }
 0x417   : > { %v1532_v44 = vpop.permute.xlu0 %1531 }
 0x418   : > { %1572 = vst.msk [vmem:[#allocation4 + $0x40] sm:$0xff] %vm1563_vm9, %v1532_v44 }
 0x419   : > { %1797 = vst.msk [vmem:[#allocation4 + $0x40] sm:$0xff] %vm1788_vm10, %v1780_v40 }
 0x41b   : > { %v2110_v51 = vpop.permute.xlu0 %2109  ;;  %v2167_v57 = vld [vmem:[#allocation4 + $0x38] sm:$0xff] }
 0x41c   : > { %2150 = vst.msk [vmem:[#allocation4 + $0x40] sm:$0xff] %vm635_vm4, %v2110_v51 }
 0x41f   : > { %v1534_v24 = vpop.permute.xlu0 %1533 }
 0x420   : > { %1573 = vst.msk [vmem:[#allocation4 + $0x48] sm:$0xff] %vm1563_vm9, %v1534_v24 }
 0x421   : > { %1798 = vst.msk [vmem:[#allocation4 + $0x48] sm:$0xff] %vm1788_vm10, %v1781_v41 }
 0x423   : > { %v2112_v46 = vpop.permute.xlu0 %2111  ;;  %v2168_v43 = vld [vmem:[#allocation4 + $0x40] sm:$0xff] }
 0x424   : > { %2151 = vst.msk [vmem:[#allocation4 + $0x48] sm:$0xff] %vm635_vm4, %v2112_v46 }
 0x427   : > { %v1536_v7 = vpop.permute.xlu0 %1535 }
 0x428   : > { %1574 = vst.msk [vmem:[#allocation4 + $0x50] sm:$0xff] %vm1563_vm9, %v1536_v7  ;;  %v2166_v7 = vld [vmem:[#allocation4 + $0x30] sm:$0xff] }
 0x429   : > { %1799 = vst.msk [vmem:[#allocation4 + $0x50] sm:$0xff] %vm1788_vm10, %v1782_v32 }
 0x42b   : > { %v2114_v17 = vpop.permute.xlu0 %2113  ;;  %v2169_v46 = vld [vmem:[#allocation4 + $0x48] sm:$0xff] }
 0x42c   : > { %2152 = vst.msk [vmem:[#allocation4 + $0x50] sm:$0xff] %vm635_vm4, %v2114_v17 }
 0x42f   : > { %v1538_v42 = vpop.permute.xlu0 %1537 }
 0x430   : > { %1575 = vst.msk [vmem:[#allocation4 + $0x58] sm:$0xff] %vm1563_vm9, %v1538_v42 }
 0x431   : > { %1800 = vst.msk [vmem:[#allocation4 + $0x58] sm:$0xff] %vm1788_vm10, %v1783_v18 }
 0x433   : > { %v2116_v50 = vpop.permute.xlu0 %2115  ;;  %v2170_v47 = vld [vmem:[#allocation4 + $0x50] sm:$0xff] }
 0x434   : > { %2153 = vst.msk [vmem:[#allocation4 + $0x58] sm:$0xff] %vm635_vm4, %v2116_v50 }
 0x437   : > { %v1540_v60 = vpop.permute.xlu0 %1539 }
 0x438   : > { %1576 = vst.msk [vmem:[#allocation4 + $0x60] sm:$0xff] %vm1563_vm9, %v1540_v60 }
 0x439   : > { %1801 = vst.msk [vmem:[#allocation4 + $0x60] sm:$0xff] %vm1788_vm10, %v1784_v45 }
 0x43b   : > { %v2118_v2 = vpop.permute.xlu0 %2117  ;;  %v2171_v0 = vld [vmem:[#allocation4 + $0x58] sm:$0xff] }
 0x43c   : > { %2154 = vst.msk [vmem:[#allocation4 + $0x60] sm:$0xff] %vm635_vm4, %v2118_v2 }
 0x43f   : > { %v1542_v25 = vpop.permute.xlu0 %1541 }
 0x440   : > { %1577 = vst.msk [vmem:[#allocation4 + $0x68] sm:$0xff] %vm1563_vm9, %v1542_v25 }
 0x441   : > { %1802 = vst.msk [vmem:[#allocation4 + $0x68] sm:$0xff] %vm1788_vm10, %v1785_v13 }
 0x443   : > { %v2120_v49 = vpop.permute.xlu0 %2119  ;;  %v2172_v29 = vld [vmem:[#allocation4 + $0x60] sm:$0xff] }
 0x444   : > { %2155 = vst.msk [vmem:[#allocation4 + $0x68] sm:$0xff] %vm635_vm4, %v2120_v49 }
 0x445   : > { %v1546_v23 = vpop.permute.xlu1 %1545 }
 0x446   : > { %1579 = vst.msk [vmem:[#allocation4 + $0x78] sm:$0xff] %vm1563_vm9, %v1546_v23 }
 0x447   : > { %1804 = vst.msk [vmem:[#allocation4 + $0x78] sm:$0xff] %vm1788_vm10, %v1787_v35  ;;  %v1544_v27 = vpop.permute.xlu0 %1543 }
 0x448   : > { %1578 = vst.msk [vmem:[#allocation4 + $0x70] sm:$0xff] %vm1563_vm9, %v1544_v27 }
 0x449   : > { %1803 = vst.msk [vmem:[#allocation4 + $0x70] sm:$0xff] %vm1788_vm10, %v1786_v62 }
 0x44b   : > { %v2122_v16 = vpop.permute.xlu0 %2121  ;;  %v2173_v15 = vld [vmem:[#allocation4 + $0x68] sm:$0xff] }
 0x44c   : > { %2156 = vst.msk [vmem:[#allocation4 + $0x70] sm:$0xff] %vm635_vm4, %v2122_v16 }
 0x44f   : > { %v2124_v26 = vpop.permute.xlu0 %2123 }
 0x450   : > { %2157 = vst.msk [vmem:[#allocation4 + $0x78] sm:$0xff] %vm635_vm4, %v2124_v26 }
 0x452   : > { %v1599_v38 = vpop.permute.xlu1 %1598 }
 0x453   : > { %v2104_v19 = vpop.permute.xlu0 %2103  ;;  %v2174_v31 = vld [vmem:[#allocation4 + $0x70] sm:$0xff]  ;;  %v1676_v32 = vmul.f32 %v1599_v38, %v3170_v21 }
 0x454   : > { %2147 = vst.msk [vmem:[#allocation4 + $0x28] sm:$0xff] %vm635_vm4, %v2104_v19 }
 0x456   : > { %v1731_v59 = vpop.permute.xlu1 %1730 }
 0x457   : > { %v1775_v28 = vadd.f32 %v1731_v59, %v1679_v11  ;;  %v1522_v10 = vpop.permute.xlu0 %1521  ;;  %v2175_v37 = vld [vmem:[#allocation4 + $0x78] sm:$0xff] }
 0x458   : > { %1567 = vst.msk [vmem:[#allocation4 + $0x18] sm:$0xff] %vm1563_vm9, %v1522_v10  ;;  %2480 = vmatprep.subr.mxu1 %v2175_v37 }
 0x459   : > { %1792 = vst.msk [vmem:[#allocation4 + $0x18] sm:$0xff] %vm1788_vm10, %v1775_v28  ;;  %2481 = vmatpush3.msra.mxu1 %v2175_v37 }
 0x45a   : > { %2482 = vmatprep.subr.mxu1 %v2174_v31  ;;  %v2102_v58 = vpop.permute.xlu1 %2101 }
 0x45b   : > { %2146 = vst.msk [vmem:[#allocation4 + $0x20] sm:$0xff] %vm635_vm4, %v2102_v58  ;;  %v1729_v61 = vpop.permute.xlu0 %1728  ;;  %2483 = vmatpush3.msra.mxu1 %v2174_v31  ;;  %v2165_v1 = vld [vmem:[#allocation4 + $0x28] sm:$0xff] }
 0x45c   : > { %2484 = vmatprep.subr.mxu1 %v2173_v15  ;;  %v1774_v40 = vadd.f32 %v1729_v61, %v1678_v39 }
 0x45d   : > { %2485 = vmatpush3.msra.mxu1 %v2173_v15 }
 0x45e   : > { %2486 = vmatprep.subr.mxu1 %v2172_v29  ;;  %v1520_v44 = vpop.permute.xlu1 %1519 }
 0x45f   : > { %1566 = vst.msk [vmem:[#allocation4 + $0x10] sm:$0xff] %vm1563_vm9, %v1520_v44  ;;  %v2100_v51 = vpop.permute.xlu0 %2099  ;;  %2487 = vmatpush3.msra.mxu1 %v2172_v29 }
 0x460   : > { %1791 = vst.msk [vmem:[#allocation4 + $0x10] sm:$0xff] %vm1788_vm10, %v1774_v40  ;;  %2488 = vmatprep.subr.mxu1 %v2171_v0 }
 0x461   : > { %2145 = vst.msk [vmem:[#allocation4 + $0x18] sm:$0xff] %vm635_vm4, %v2100_v51  ;;  %2489 = vmatpush3.msra.mxu1 %v2171_v0 }
 0x462   : > { %2490 = vmatprep.subr.mxu1 %v2170_v47  ;;  %v1727_v20 = vpop.permute.xlu1 %1726  ;;  %v2164_v18 = vld [vmem:[#allocation4 + $0x20] sm:$0xff] }
 0x463   : > { %v1773_v41 = vadd.f32 %v1727_v20, %v1677_v3  ;;  %v1518_v24 = vpop.permute.xlu0 %1517  ;;  %2491 = vmatpush3.msra.mxu1 %v2170_v47 }
 0x464   : > { %1565 = vst.msk [vmem:[#allocation4 + $0x8] sm:$0xff] %vm1563_vm9, %v1518_v24  ;;  %2492 = vmatprep.subr.mxu1 %v2169_v46 }
 0x465   : > { %1790 = vst.msk [vmem:[#allocation4 + $0x8] sm:$0xff] %vm1788_vm10, %v1773_v41  ;;  %2493 = vmatpush3.msra.mxu1 %v2169_v46 }
 0x466   : > { %2494 = vmatprep.subr.mxu1 %v2168_v43  ;;  %v2098_v4 = vpop.permute.xlu1 %2097 }
 0x467   : > { %2144 = vst.msk [vmem:[#allocation4 + $0x10] sm:$0xff] %vm635_vm4, %v2098_v4  ;;  %v1725_v48 = vpop.permute.xlu0 %1724  ;;  %2495 = vmatpush3.msra.mxu1 %v2168_v43 }
 0x468   : > { %2496 = vmatprep.subr.mxu1 %v2167_v57  ;;  %v1772_v17 = vadd.f32 %v1725_v48, %v1676_v32  ;;  %v2163_v42 = vld [vmem:[#allocation4 + $0x18] sm:$0xff] }
 0x469   : > { %2497 = vmatpush3.msra.mxu1 %v2167_v57 }
 0x46a   : > { %2498 = vmatprep.subr.mxu1 %v2166_v7  ;;  %v1516_v53 = vpop.permute.xlu1 %1515 }
 0x46b   : > { %1564 = vst.msk [vmem:[#allocation4] sm:$0xff] %vm1563_vm9, %v1516_v53  ;;  %v2096_v6 = vpop.permute.xlu0 %2095  ;;  %2499 = vmatpush3.msra.mxu1 %v2166_v7 }
 0x46c   : > { %1789 = vst.msk [vmem:[#allocation4] sm:$0xff] %vm1788_vm10, %v1772_v17  ;;  %2500 = vmatprep.subr.mxu1 %v2165_v1 }
 0x46d   : > { %2143 = vst.msk [vmem:[#allocation4 + $0x8] sm:$0xff] %vm635_vm4, %v2096_v6  ;;  %2501 = vmatpush3.msra.mxu1 %v2165_v1 }
 0x46e   : > { %2502 = vmatprep.subr.mxu1 %v2164_v18  ;;  %v2094_v21 = vpop.permute.xlu1 %2093  ;;  %v2162_v50 = vld [vmem:[#allocation4 + $0x10] sm:$0xff] }
 0x46f   : > { %2142 = vst.msk [vmem:[#allocation4] sm:$0xff] %vm635_vm4, %v2094_v21  ;;  %2503 = vmatpush3.msra.mxu1 %v2164_v18 }
 0x470   : > { %2504 = vmatprep.subr.mxu1 %v2163_v42 }
 0x471   : > { %2505 = vmatpush3.msra.mxu1 %v2163_v42 }
 0x472   : > { %2506 = vmatprep.subr.mxu1 %v2162_v50 }
 0x473   : > { %2507 = vmatpush3.msra.mxu1 %v2162_v50 }
 0x474   : > { %v2161_v8 = vld [vmem:[#allocation4 + $0x8] sm:$0xff] }
 0x475   : > { %2508 = vmatprep.subr.mxu1 %v2161_v8 }
 0x476   : > { %2509 = vmatpush3.msra.mxu1 %v2161_v8  ;;  %v2160_v56 = vld [vmem:[#allocation4] sm:$0xff] }
 0x477   : > { %2510 = vmatprep.subr.mxu1 %v2160_v56 }
 0x478   : > { %2511 = vmatpush3.msra.mxu1 %v2160_v56 }
 0x479   : > { %2513 = vmatmul.mubr.msk.f32.vlgmr.msra.gmra.mxu1 %vm769_vm6, %v2684_v9 }
 0x539   : > { %v2514_v12 = vpop.f32.mrf.mxu1 }
 0x53a   : > { %2261 = vst [vmem:[%s407_s19 + $0x8] sm:$0xff] %v2514_v12 }
 0x53b   : > { %v2242_v54 = vpop.f32.mrf.mxu1 }
 0x53c   : > { %2260 = vst [vmem:[%s407_s19] sm:$0xff] %v2242_v54 }
 0x53d   : > { %2611 = shalt.err (!%p2608_p6)
}
 0x53e   : > { %s2612_s28 = scalar_lea.hbm %s3797_s29, 256  ;;  %s2616_s27 = scalar_lea.hbm %s3854_s10, 512 }
 0x53f   : > { %p2613_p7 = scmp.ne.s32.totalorder %s3797_s29, %s2612_s28  ;;  %p2617_p11 = scmp.lt.s32.totalorder %s3797_s29, %s3854_s10 }
 0x540   : > { %p2618_p12 = scmp.lt.s32.totalorder %s2616_s27, %s2612_s28 }
 0x541   : > { %p2614_p9 = pnand %p2613_p7, %p2783_p4 }
 0x542   : > { %p2619_p13 = por %p2618_p12, %p2617_p11 }
 0x543   : > { %p2615_p10 = pneg %p2614_p9 }
 0x545   : > { %p2620_p0 = pnand %p2619_p13, %p2615_p10 }
 0x547   : > { %2623 = shalt.err (!%p2620_p0)
}
 0x548   : > { %s2686_s0 = smov 128   ;;  %s2687_s11 = smov 8  }
 0x549   : > { %2515 = dma.vmem_to_hbm [thread:$0]  (%p2783_p4), %s3792_s20, 256, %s3797_s29, %s3799_s30, %s2686_s0, %s2686_s0, %s2687_s11  }
 0x54a PF: > { %p2521_p1 = scmp.ge.s32.totalorder %s2674_s18, 2  ;;  %s2291_s12 = sand.u32 1, %s2654_s13  }
 0x54b   : > { %s2292_s28 = scalar_lea.sflag [#allocation6], %s2291_s12 }
 0x54c   : > { %p2518_p2 = pnand %p2521_p1, %p2790_p8 }
 0x54e   : > { %p2519_p3 = pneg %p2518_p2 }
 0x550   : > { %2649 = dma.done.wait (%p2519_p3), %s2292_s28, 256  }
 0x551   : > { %2651 = vsyncadd (%p2519_p3), %s2292_s28, 4294967040  ;;  %s23_s18 = sadd.s32 1, %s2674_s18   ;;  %s3900_s13 = smov %s2658_s14 }
 0x552   : > { %p20_p5 = scmp.ge.s32.totalorder %s23_s18, 4   ;;  %s3901_s14 = smov %s2662_s15 }
 0x553   : > { %s3902_s15 = smov %s2796_s26  ;;  %s3903_s16 = smov %s2670_s17 }
 0x554   : > { %s3904_s17 = smov %s3906_s21  ;;  %22 = sbr.rel (!%p20_p5) target bundleno = 6 (0x6), region = 109 }
 0x559   :  { %2297 = vsyncpa [#allocation6], 1 }
 0x55a   :  { %2299 = vsyncpa [#allocation6 + $0x1], 1 }

</bundles_post_ra>
